<compile_context>
chip_gen: v6e
topology: v6e:2x2x1
jax: 0.10.0
libtpu: 0.0.40
codegen_flags: <defaults>
</compile_context>

<pallas_src>
import math

import numpy as np
import jax
import jax.numpy as jnp
from jax.experimental import pallas as pl
from jax.experimental.pallas import tpu as pltpu

F32 = jnp.float32
BF16 = jnp.bfloat16


def _vmem():
    # Whole-array block resident in VMEM (shapes are tiny; no grid tiling needed).
    return pl.BlockSpec(memory_space=pltpu.MemorySpace.VMEM)


# ----------------------------- Pallas kernels -----------------------------

def _conv1_relu_pool_kernel(p_ref, w_ref, b_ref, o_ref):
    """Stage 1: maxpool2x2(relu(conv1(x))), transposed / lane-dense form.

    p_ref : [4, 75, M] bf16  pooling-window-grouped, transposed im2col patches
    w_ref : [6, 75]    bf16  conv1 weight (torch reshape layout, no transpose)
    b_ref : [6, 1]     f32   conv1 bias
    o_ref : [6, M]     bf16  pooled activations, channel-major (lane-dense)
    """
    w = w_ref[...]
    m = None
    for k in range(p_ref.shape[0]):          # 4 pooling-window slabs, unrolled
        y = jnp.dot(w, p_ref[k], preferred_element_type=jnp.float32)   # [6, M] f32
        m = y if m is None else jnp.maximum(m, y)   # 2x2 max-pool across slabs
    # bias + ReLU hoisted out of the pooling loop (commutes with max).
    o_ref[...] = jnp.maximum(m + b_ref[...], 0.0).astype(o_ref.dtype)


def _conv2_fc_head_kernel(p_ref, w2_ref, b2_ref, w1f_ref, b1f_ref, w2f_ref,
                          b2f_ref, o_ref, pooled_ref, feat_ref):
    """Fused stage 2+3: relu(fc2(relu(fc1(flatten(pool(relu(conv2(.)))))))).

    p_ref   : [4, 25*B, 150] bf16  pool-grouped im2col patches (row = pixel*B + b)
    w2_ref  : [150, 16]      bf16  conv2 weight ("column" layout)
    b2_ref  : [1, 16]        f32
    w1f_ref : [400, 120]     bf16  fc1 weight, rows pre-permuted to (pixel*16 + ch)
    b1f_ref : [1, 120]       f32
    w2f_ref : [120, 84]      bf16
    b2f_ref : [1, 84]        f32
    o_ref   : [B, 84]        f32
    pooled_ref : VMEM scratch [25*B, 16] f32
    feat_ref   : VMEM scratch [B, 400]   f32
    """
    B = feat_ref.shape[0]

    m = None
    for k in range(p_ref.shape[0]):          # 4 pooling-window slabs, unrolled
        y = jnp.dot(p_ref[k], w2_ref[...], preferred_element_type=jnp.float32)  # [25B,16]
        m = y if m is None else jnp.maximum(m, y)
    pooled_ref[...] = jnp.maximum(m + b2_ref[...], 0.0)     # hoisted bias + ReLU

    # Flatten [(pixel, batch) rows, 16 ch] -> [B, 400] entirely inside VMEM with
    # 25 static sliced copies.  Feature order is pixel*16 + ch, which matches the
    # permuted fc1 weight -- no NCHW transpose anywhere, no HBM round-trip.
    for p in range(25):
        feat_ref[:, 16 * p:16 * (p + 1)] = pooled_ref[p * B:(p + 1) * B, :]

    feat = feat_ref[...].astype(jnp.bfloat16)
    h = jnp.dot(feat, w1f_ref[...], preferred_element_type=jnp.float32)
    h = jnp.maximum(h + b1f_ref[...], 0.0)
    y2 = jnp.dot(h.astype(jnp.bfloat16), w2f_ref[...],
                 preferred_element_type=jnp.float32)
    # Trailing ReLU is part of the reference module: x = relu(fc2(x)).
    o_ref[...] = jnp.maximum(y2 + b2f_ref[...], 0.0)


# ---------------------------- pallas_call wrappers --------------------------

def conv1_relu_pool(p1, w1r, b1):
    M = p1.shape[2]
    return pl.pallas_call(
        _conv1_relu_pool_kernel,
        out_shape=jax.ShapeDtypeStruct((6, M), BF16),
        in_specs=[_vmem(), _vmem(), _vmem()],
        out_specs=_vmem(),
    )(p1, w1r, b1)


def conv2_fc_head(p2, w2c, b2, w1f, b1f, w2f, b2f):
    B = p2.shape[1] // 25
    return pl.pallas_call(
        _conv2_fc_head_kernel,
        out_shape=jax.ShapeDtypeStruct((B, 84), F32),
        in_specs=[_vmem()] * 7,
        out_specs=_vmem(),
        scratch_shapes=[pltpu.VMEM((25 * B, 16), F32),
                        pltpu.VMEM((B, 400), F32)],
    )(p2, w2c, b2, w1f, b1f, w2f, b2f)


# ------------------- JAX glue: im2col gathers (layout plumbing only) --------

def _im2col_conv1_T(x_bf16):
    """x: [B,3,32,32] bf16 -> transposed pool-grouped patches [4, 75, B*196].

    Slab w = 2x2 pooling-window position; feature f = c*25 + di*5 + dj (matches
    torch W1.reshape(6,75)); column m = b*196 + pi*14 + pj."""
    B = x_bf16.shape[0]
    M = B * 196
    w = np.arange(4); wi, wj = w // 2, w % 2
    f = np.arange(75); c, di, dj = f // 25, (f % 25) // 5, f % 5
    m = np.arange(M); b, pi, pj = m // 196, (m % 196) // 14, m % 14
    h = 2 * pi[None, None, :] + wi[:, None, None] + di[None, :, None]
    v = 2 * pj[None, None, :] + wj[:, None, None] + dj[None, :, None]
    flat = (((b[None, None, :] * 3 + c[None, :, None]) * 32 + h) * 32 + v)
    idx = jnp.asarray(flat.astype(np.int32))
    return jnp.take(x_bf16.reshape(-1), idx, axis=0)            # [4, 75, M]


def _im2col_conv2(pooled1, B):
    """pooled1: [6, B*196] bf16 (channel-major, col = b*196 + h*14 + w) ->
    pool-grouped conv2 patches [4, 25*B, 150] with row = pixel*B + b and
    feature f = c*25 + di*5 + dj (matches torch W2.reshape(16,150))."""
    M2 = 25 * B
    w = np.arange(4); wi, wj = w // 2, w % 2
    r = np.arange(M2); p, b = r // B, r % B
    pi, pj = p // 5, p % 5
    f = np.arange(150); c, di, dj = f // 25, (f % 25) // 5, f % 5
    hh = 2 * pi[None, :, None] + wi[:, None, None] + di[None, None, :]
    vv = 2 * pj[None, :, None] + wj[:, None, None] + dj[None, None, :]
    flat = (c[None, None, :] * (196 * B) + b[None, :, None] * 196 + hh * 14 + vv)
    idx = jnp.asarray(flat.astype(np.int32))
    return jnp.take(pooled1.reshape(-1), idx, axis=0)           # [4, 25B, 150]


# ------------------------------- params / forward ---------------------------

def init_params(key):
    ks = jax.random.split(key, 8)

    def uniform(k, shape, fan_in):
        bound = 1.0 / math.sqrt(fan_in)
        return jax.random.uniform(k, shape, F32, -bound, bound)

    w1 = uniform(ks[0], (6, 3, 5, 5), 3 * 25)
    b1 = uniform(ks[1], (6,), 3 * 25)
    w2 = uniform(ks[2], (16, 6, 5, 5), 6 * 25)
    b2 = uniform(ks[3], (16,), 6 * 25)
    fc1_w = uniform(ks[4], (120, 400), 400)
    fc1_b = uniform(ks[5], (120,), 400)
    fc2_w = uniform(ks[6], (84, 120), 120)
    fc2_b = uniform(ks[7], (84,), 120)

    # Permute fc1 input rows from torch NCHW-flatten order (c*25 + p) to the
    # kernel's pixel-major order (p*16 + c): kills the runtime flatten transpose.
    perm = np.array([c * 25 + p for p in range(25) for c in range(16)], np.int32)

    return {
        # MXU operands stored bf16 (DMA bytes halved); biases stay f32.
        "w1r": w1.reshape(6, 75).astype(BF16),            # conv1, row layout
        "b1": b1.reshape(6, 1),
        "w2c": w2.reshape(16, 150).T.astype(BF16),        # conv2, column layout
        "b2": b2.reshape(1, 16),
        "fc1_w": fc1_w.T[perm].astype(BF16),              # [400,120], rows permuted
        "fc1_b": fc1_b.reshape(1, 120),
        "fc2_w": fc2_w.T.astype(BF16),                    # [120,84]
        "fc2_b": fc2_b.reshape(1, 84),
    }


def conv_module_forward(params, x):
    B = x.shape[0]
    xb = x.astype(BF16)                                   # pre-cast MXU operand

    # Kernel 1: conv1 + bias + ReLU + maxpool(2,2), lane-dense [6, B*196] output.
    p1 = _im2col_conv1_T(xb)                              # [4, 75, B*196] bf16
    pooled1 = conv1_relu_pool(p1, params["w1r"], params["b1"])     # [6, B*196] bf16

    # Kernel 2: conv2 + bias + ReLU + maxpool(2,2) + flatten + fc1 + ReLU + fc2 + ReLU.
    p2 = _im2col_conv2(pooled1, B)                        # [4, 25B, 150] bf16
    return conv2_fc_head(p2, params["w2c"], params["b2"],
                         params["fc1_w"], params["fc1_b"],
                         params["fc2_w"], params["fc2_b"])          # [B, 84] f32


if __name__ == "__main__":
    key = jax.random.PRNGKey(0)
    kp, kx = jax.random.split(key)
    params = init_params(kp)
    x = jax.random.normal(kx, (2, 3, 32, 32), dtype=F32)

    out = jax.jit(conv_module_forward)(params, x)
    jax.block_until_ready(out)
    assert out.shape == (2, 84), out.shape
    print("KERNEL_OK")
</pallas_src>

<mosaic_0001>
module attributes {stable_mosaic.version = 11 : i64} {
  func.func @_conv1_relu_pool_kernel(%arg0: memref<4x75x392xbf16, #tpu.memory_space<vmem>>, %arg1: memref<6x75xbf16, #tpu.memory_space<vmem>>, %arg2: memref<6x1xf32, #tpu.memory_space<vmem>>, %arg3: memref<6x392xbf16, #tpu.memory_space<vmem>>) attributes {dimension_semantics = [], scalar_prefetch = 0 : i64, scratch_operands = 0 : i64, tpu.core_type = #tpu.core_type<tc>} {
    %c0 = arith.constant 0 : index
    %c0_0 = arith.constant 0 : index
    %0 = vector.load %arg1[%c0, %c0_0] : memref<6x75xbf16, #tpu.memory_space<vmem>>, vector<6x75xbf16>
    %c0_1 = arith.constant 0 : index
    %c0_2 = arith.constant 0 : index
    %c0_3 = arith.constant 0 : index
    %1 = vector.load %arg0[%c0_1, %c0_2, %c0_3] : memref<4x75x392xbf16, #tpu.memory_space<vmem>>, vector<1x75x392xbf16>
    %2 = vector.shape_cast %1 : vector<1x75x392xbf16> to vector<75x392xbf16>
    %cst = arith.constant dense<0.000000e+00> : vector<6x392xf32>
    %3 = tpu.matmul %0, %2, %cst {dimension_numbers = #tpu.dot_dimension_numbers<[1], [0], [0], [1], [0, 0, 1, 1], [], []>} : vector<6x75xbf16>, vector<75x392xbf16>, vector<6x392xf32> -> vector<6x392xf32>
    %c1 = arith.constant 1 : index
    %c0_4 = arith.constant 0 : index
    %c0_5 = arith.constant 0 : index
    %4 = vector.load %arg0[%c1, %c0_4, %c0_5] : memref<4x75x392xbf16, #tpu.memory_space<vmem>>, vector<1x75x392xbf16>
    %5 = vector.shape_cast %4 : vector<1x75x392xbf16> to vector<75x392xbf16>
    %cst_6 = arith.constant dense<0.000000e+00> : vector<6x392xf32>
    %6 = tpu.matmul %0, %5, %cst_6 {dimension_numbers = #tpu.dot_dimension_numbers<[1], [0], [0], [1], [0, 0, 1, 1], [], []>} : vector<6x75xbf16>, vector<75x392xbf16>, vector<6x392xf32> -> vector<6x392xf32>
    %7 = arith.maximumf %3, %6 : vector<6x392xf32>
    %c2 = arith.constant 2 : index
    %c0_7 = arith.constant 0 : index
    %c0_8 = arith.constant 0 : index
    %8 = vector.load %arg0[%c2, %c0_7, %c0_8] : memref<4x75x392xbf16, #tpu.memory_space<vmem>>, vector<1x75x392xbf16>
    %9 = vector.shape_cast %8 : vector<1x75x392xbf16> to vector<75x392xbf16>
    %cst_9 = arith.constant dense<0.000000e+00> : vector<6x392xf32>
    %10 = tpu.matmul %0, %9, %cst_9 {dimension_numbers = #tpu.dot_dimension_numbers<[1], [0], [0], [1], [0, 0, 1, 1], [], []>} : vector<6x75xbf16>, vector<75x392xbf16>, vector<6x392xf32> -> vector<6x392xf32>
    %11 = arith.maximumf %7, %10 : vector<6x392xf32>
    %c3 = arith.constant 3 : index
    %c0_10 = arith.constant 0 : index
    %c0_11 = arith.constant 0 : index
    %12 = vector.load %arg0[%c3, %c0_10, %c0_11] : memref<4x75x392xbf16, #tpu.memory_space<vmem>>, vector<1x75x392xbf16>
    %13 = vector.shape_cast %12 : vector<1x75x392xbf16> to vector<75x392xbf16>
    %cst_12 = arith.constant dense<0.000000e+00> : vector<6x392xf32>
    %14 = tpu.matmul %0, %13, %cst_12 {dimension_numbers = #tpu.dot_dimension_numbers<[1], [0], [0], [1], [0, 0, 1, 1], [], []>} : vector<6x75xbf16>, vector<75x392xbf16>, vector<6x392xf32> -> vector<6x392xf32>
    %15 = arith.maximumf %11, %14 : vector<6x392xf32>
    %c0_13 = arith.constant 0 : index
    %c0_14 = arith.constant 0 : index
    %16 = vector.load %arg2[%c0_13, %c0_14] : memref<6x1xf32, #tpu.memory_space<vmem>>, vector<6x1xf32>
    %17 = vector.broadcast %16 : vector<6x1xf32> to vector<6x392xf32>
    %18 = arith.addf %15, %17 : vector<6x392xf32>
    %cst_15 = arith.constant 0.000000e+00 : f32
    %19 = vector.broadcast %cst_15 : f32 to vector<6x392xf32>
    %20 = arith.maximumf %18, %19 : vector<6x392xf32>
    %21 = arith.truncf %20 : vector<6x392xf32> to vector<6x392xbf16>
    %c0_16 = arith.constant 0 : index
    %c0_17 = arith.constant 0 : index
    %22 = vector.load %arg3[%c0_16, %c0_17] : memref<6x392xbf16, #tpu.memory_space<vmem>>, vector<6x392xbf16>
    tpu.vector_store %arg3[%c0_16, %c0_17], %21 {strides = array<i32>} : memref<6x392xbf16, #tpu.memory_space<vmem>>, vector<6x392xbf16>,
    return
  }
}

module attributes {stable_mosaic.version = 11 : i64} {
  func.func @_conv2_fc_head_kernel(%arg0: memref<4x50x150xbf16, #tpu.memory_space<vmem>>, %arg1: memref<150x16xbf16, #tpu.memory_space<vmem>>, %arg2: memref<1x16xf32, #tpu.memory_space<vmem>>, %arg3: memref<400x120xbf16, #tpu.memory_space<vmem>>, %arg4: memref<1x120xf32, #tpu.memory_space<vmem>>, %arg5: memref<120x84xbf16, #tpu.memory_space<vmem>>, %arg6: memref<1x84xf32, #tpu.memory_space<vmem>>, %arg7: memref<2x84xf32, #tpu.memory_space<vmem>>, %arg8: memref<50x16xf32, #tpu.memory_space<vmem>>, %arg9: memref<2x400xf32, #tpu.memory_space<vmem>>) attributes {dimension_semantics = [], scalar_prefetch = 0 : i64, scratch_operands = 2 : i64, tpu.core_type = #tpu.core_type<tc>} {
    %c0 = arith.constant 0 : index
    %c0_0 = arith.constant 0 : index
    %c0_1 = arith.constant 0 : index
    %0 = vector.load %arg0[%c0, %c0_0, %c0_1] : memref<4x50x150xbf16, #tpu.memory_space<vmem>>, vector<1x50x150xbf16>
    %1 = vector.shape_cast %0 : vector<1x50x150xbf16> to vector<50x150xbf16>
    %c0_2 = arith.constant 0 : index
    %c0_3 = arith.constant 0 : index
    %2 = vector.load %arg1[%c0_2, %c0_3] : memref<150x16xbf16, #tpu.memory_space<vmem>>, vector<150x16xbf16>
    %cst = arith.constant dense<0.000000e+00> : vector<50x16xf32>
    %3 = tpu.matmul %1, %2, %cst {dimension_numbers = #tpu.dot_dimension_numbers<[1], [0], [0], [1], [0, 0, 1, 1], [], []>} : vector<50x150xbf16>, vector<150x16xbf16>, vector<50x16xf32> -> vector<50x16xf32>
    %c1 = arith.constant 1 : index
    %c0_4 = arith.constant 0 : index
    %c0_5 = arith.constant 0 : index
    %4 = vector.load %arg0[%c1, %c0_4, %c0_5] : memref<4x50x150xbf16, #tpu.memory_space<vmem>>, vector<1x50x150xbf16>
    %5 = vector.shape_cast %4 : vector<1x50x150xbf16> to vector<50x150xbf16>
    %c0_6 = arith.constant 0 : index
    %c0_7 = arith.constant 0 : index
    %6 = vector.load %arg1[%c0_6, %c0_7] : memref<150x16xbf16, #tpu.memory_space<vmem>>, vector<150x16xbf16>
    %cst_8 = arith.constant dense<0.000000e+00> : vector<50x16xf32>
    %7 = tpu.matmul %5, %6, %cst_8 {dimension_numbers = #tpu.dot_dimension_numbers<[1], [0], [0], [1], [0, 0, 1, 1], [], []>} : vector<50x150xbf16>, vector<150x16xbf16>, vector<50x16xf32> -> vector<50x16xf32>
    %8 = arith.maximumf %3, %7 : vector<50x16xf32>
    %c2 = arith.constant 2 : index
    %c0_9 = arith.constant 0 : index
    %c0_10 = arith.constant 0 : index
    %9 = vector.load %arg0[%c2, %c0_9, %c0_10] : memref<4x50x150xbf16, #tpu.memory_space<vmem>>, vector<1x50x150xbf16>
    %10 = vector.shape_cast %9 : vector<1x50x150xbf16> to vector<50x150xbf16>
    %c0_11 = arith.constant 0 : index
    %c0_12 = arith.constant 0 : index
    %11 = vector.load %arg1[%c0_11, %c0_12] : memref<150x16xbf16, #tpu.memory_space<vmem>>, vector<150x16xbf16>
    %cst_13 = arith.constant dense<0.000000e+00> : vector<50x16xf32>
    %12 = tpu.matmul %10, %11, %cst_13 {dimension_numbers = #tpu.dot_dimension_numbers<[1], [0], [0], [1], [0, 0, 1, 1], [], []>} : vector<50x150xbf16>, vector<150x16xbf16>, vector<50x16xf32> -> vector<50x16xf32>
    %13 = arith.maximumf %8, %12 : vector<50x16xf32>
    %c3 = arith.constant 3 : index
    %c0_14 = arith.constant 0 : index
    %c0_15 = arith.constant 0 : index
    %14 = vector.load %arg0[%c3, %c0_14, %c0_15] : memref<4x50x150xbf16, #tpu.memory_space<vmem>>, vector<1x50x150xbf16>
    %15 = vector.shape_cast %14 : vector<1x50x150xbf16> to vector<50x150xbf16>
    %c0_16 = arith.constant 0 : index
    %c0_17 = arith.constant 0 : index
    %16 = vector.load %arg1[%c0_16, %c0_17] : memref<150x16xbf16, #tpu.memory_space<vmem>>, vector<150x16xbf16>
    %cst_18 = arith.constant dense<0.000000e+00> : vector<50x16xf32>
    %17 = tpu.matmul %15, %16, %cst_18 {dimension_numbers = #tpu.dot_dimension_numbers<[1], [0], [0], [1], [0, 0, 1, 1], [], []>} : vector<50x150xbf16>, vector<150x16xbf16>, vector<50x16xf32> -> vector<50x16xf32>
    %18 = arith.maximumf %13, %17 : vector<50x16xf32>
    %c0_19 = arith.constant 0 : index
    %c0_20 = arith.constant 0 : index
    %19 = vector.load %arg2[%c0_19, %c0_20] : memref<1x16xf32, #tpu.memory_space<vmem>>, vector<1x16xf32>
    %20 = vector.broadcast %19 : vector<1x16xf32> to vector<50x16xf32>
    %21 = arith.addf %18, %20 : vector<50x16xf32>
    %cst_21 = arith.constant 0.000000e+00 : f32
    %22 = vector.broadcast %cst_21 : f32 to vector<50x16xf32>
    %23 = arith.maximumf %21, %22 : vector<50x16xf32>
    %c0_22 = arith.constant 0 : index
    %c0_23 = arith.constant 0 : index
    %24 = vector.load %arg8[%c0_22, %c0_23] : memref<50x16xf32, #tpu.memory_space<vmem>>, vector<50x16xf32>
    tpu.vector_store %arg8[%c0_22, %c0_23], %23 {strides = array<i32>} : memref<50x16xf32, #tpu.memory_space<vmem>>, vector<50x16xf32>,
    %c0_24 = arith.constant 0 : index
    %c0_25 = arith.constant 0 : index
    %25 = vector.load %arg8[%c0_24, %c0_25] : memref<50x16xf32, #tpu.memory_space<vmem>>, vector<2x16xf32>
    %c0_26 = arith.constant 0 : index
    %c0_27 = arith.constant 0 : index
    %26 = vector.load %arg9[%c0_26, %c0_27] : memref<2x400xf32, #tpu.memory_space<vmem>>, vector<2x16xf32>
    tpu.vector_store %arg9[%c0_26, %c0_27], %25 {strides = array<i32>} : memref<2x400xf32, #tpu.memory_space<vmem>>, vector<2x16xf32>,
    %c2_28 = arith.constant 2 : index
    %c0_29 = arith.constant 0 : index
    %27 = vector.load %arg8[%c2_28, %c0_29] : memref<50x16xf32, #tpu.memory_space<vmem>>, vector<2x16xf32>
    %c0_30 = arith.constant 0 : index
    %c16 = arith.constant 16 : index
    %28 = vector.load %arg9[%c0_30, %c16] : memref<2x400xf32, #tpu.memory_space<vmem>>, vector<2x16xf32>
    tpu.vector_store %arg9[%c0_30, %c16], %27 {strides = array<i32>} : memref<2x400xf32, #tpu.memory_space<vmem>>, vector<2x16xf32>,
    %c4 = arith.constant 4 : index
    %c0_31 = arith.constant 0 : index
    %29 = vector.load %arg8[%c4, %c0_31] : memref<50x16xf32, #tpu.memory_space<vmem>>, vector<2x16xf32>
    %c0_32 = arith.constant 0 : index
    %c32 = arith.constant 32 : index
    %30 = vector.load %arg9[%c0_32, %c32] : memref<2x400xf32, #tpu.memory_space<vmem>>, vector<2x16xf32>
    tpu.vector_store %arg9[%c0_32, %c32], %29 {strides = array<i32>} : memref<2x400xf32, #tpu.memory_space<vmem>>, vector<2x16xf32>,
    %c6 = arith.constant 6 : index
    %c0_33 = arith.constant 0 : index
    %31 = vector.load %arg8[%c6, %c0_33] : memref<50x16xf32, #tpu.memory_space<vmem>>, vector<2x16xf32>
    %c0_34 = arith.constant 0 : index
    %c48 = arith.constant 48 : index
    %32 = vector.load %arg9[%c0_34, %c48] : memref<2x400xf32, #tpu.memory_space<vmem>>, vector<2x16xf32>
    tpu.vector_store %arg9[%c0_34, %c48], %31 {strides = array<i32>} : memref<2x400xf32, #tpu.memory_space<vmem>>, vector<2x16xf32>,
    %c8 = arith.constant 8 : index
    %c0_35 = arith.constant 0 : index
    %33 = vector.load %arg8[%c8, %c0_35] : memref<50x16xf32, #tpu.memory_space<vmem>>, vector<2x16xf32>
    %c0_36 = arith.constant 0 : index
    %c64 = arith.constant 64 : index
    %34 = vector.load %arg9[%c0_36, %c64] : memref<2x400xf32, #tpu.memory_space<vmem>>, vector<2x16xf32>
    tpu.vector_store %arg9[%c0_36, %c64], %33 {strides = array<i32>} : memref<2x400xf32, #tpu.memory_space<vmem>>, vector<2x16xf32>,
    %c10 = arith.constant 10 : index
    %c0_37 = arith.constant 0 : index
    %35 = vector.load %arg8[%c10, %c0_37] : memref<50x16xf32, #tpu.memory_space<vmem>>, vector<2x16xf32>
    %c0_38 = arith.constant 0 : index
    %c80 = arith.constant 80 : index
    %36 = vector.load %arg9[%c0_38, %c80] : memref<2x400xf32, #tpu.memory_space<vmem>>, vector<2x16xf32>
    tpu.vector_store %arg9[%c0_38, %c80], %35 {strides = array<i32>} : memref<2x400xf32, #tpu.memory_space<vmem>>, vector<2x16xf32>,
    %c12 = arith.constant 12 : index
    %c0_39 = arith.constant 0 : index
    %37 = vector.load %arg8[%c12, %c0_39] : memref<50x16xf32, #tpu.memory_space<vmem>>, vector<2x16xf32>
    %c0_40 = arith.constant 0 : index
    %c96 = arith.constant 96 : index
    %38 = vector.load %arg9[%c0_40, %c96] : memref<2x400xf32, #tpu.memory_space<vmem>>, vector<2x16xf32>
    tpu.vector_store %arg9[%c0_40, %c96], %37 {strides = array<i32>} : memref<2x400xf32, #tpu.memory_space<vmem>>, vector<2x16xf32>,
    %c14 = arith.constant 14 : index
    %c0_41 = arith.constant 0 : index
    %39 = vector.load %arg8[%c14, %c0_41] : memref<50x16xf32, #tpu.memory_space<vmem>>, vector<2x16xf32>
    %c0_42 = arith.constant 0 : index
    %c112 = arith.constant 112 : index
    %40 = vector.load %arg9[%c0_42, %c112] : memref<2x400xf32, #tpu.memory_space<vmem>>, vector<2x16xf32>
    tpu.vector_store %arg9[%c0_42, %c112], %39 {strides = array<i32>} : memref<2x400xf32, #tpu.memory_space<vmem>>, vector<2x16xf32>,
    %c16_43 = arith.constant 16 : index
    %c0_44 = arith.constant 0 : index
    %41 = vector.load %arg8[%c16_43, %c0_44] : memref<50x16xf32, #tpu.memory_space<vmem>>, vector<2x16xf32>
    %c0_45 = arith.constant 0 : index
    %c128 = arith.constant 128 : index
    %42 = vector.load %arg9[%c0_45, %c128] : memref<2x400xf32, #tpu.memory_space<vmem>>, vector<2x16xf32>
    tpu.vector_store %arg9[%c0_45, %c128], %41 {strides = array<i32>} : memref<2x400xf32, #tpu.memory_space<vmem>>, vector<2x16xf32>,
    %c18 = arith.constant 18 : index
    %c0_46 = arith.constant 0 : index
    %43 = vector.load %arg8[%c18, %c0_46] : memref<50x16xf32, #tpu.memory_space<vmem>>, vector<2x16xf32>
    %c0_47 = arith.constant 0 : index
    %c144 = arith.constant 144 : index
    %44 = vector.load %arg9[%c0_47, %c144] : memref<2x400xf32, #tpu.memory_space<vmem>>, vector<2x16xf32>
    tpu.vector_store %arg9[%c0_47, %c144], %43 {strides = array<i32>} : memref<2x400xf32, #tpu.memory_space<vmem>>, vector<2x16xf32>,
    %c20 = arith.constant 20 : index
    %c0_48 = arith.constant 0 : index
    %45 = vector.load %arg8[%c20, %c0_48] : memref<50x16xf32, #tpu.memory_space<vmem>>, vector<2x16xf32>
    %c0_49 = arith.constant 0 : index
    %c160 = arith.constant 160 : index
    %46 = vector.load %arg9[%c0_49, %c160] : memref<2x400xf32, #tpu.memory_space<vmem>>, vector<2x16xf32>
    tpu.vector_store %arg9[%c0_49, %c160], %45 {strides = array<i32>} : memref<2x400xf32, #tpu.memory_space<vmem>>, vector<2x16xf32>,
    %c22 = arith.constant 22 : index
    %c0_50 = arith.constant 0 : index
    %47 = vector.load %arg8[%c22, %c0_50] : memref<50x16xf32, #tpu.memory_space<vmem>>, vector<2x16xf32>
    %c0_51 = arith.constant 0 : index
    %c176 = arith.constant 176 : index
    %48 = vector.load %arg9[%c0_51, %c176] : memref<2x400xf32, #tpu.memory_space<vmem>>, vector<2x16xf32>
    tpu.vector_store %arg9[%c0_51, %c176], %47 {strides = array<i32>} : memref<2x400xf32, #tpu.memory_space<vmem>>, vector<2x16xf32>,
    %c24 = arith.constant 24 : index
    %c0_52 = arith.constant 0 : index
    %49 = vector.load %arg8[%c24, %c0_52] : memref<50x16xf32, #tpu.memory_space<vmem>>, vector<2x16xf32>
    %c0_53 = arith.constant 0 : index
    %c192 = arith.constant 192 : index
    %50 = vector.load %arg9[%c0_53, %c192] : memref<2x400xf32, #tpu.memory_space<vmem>>, vector<2x16xf32>
    tpu.vector_store %arg9[%c0_53, %c192], %49 {strides = array<i32>} : memref<2x400xf32, #tpu.memory_space<vmem>>, vector<2x16xf32>,
    %c26 = arith.constant 26 : index
    %c0_54 = arith.constant 0 : index
    %51 = vector.load %arg8[%c26, %c0_54] : memref<50x16xf32, #tpu.memory_space<vmem>>, vector<2x16xf32>
    %c0_55 = arith.constant 0 : index
    %c208 = arith.constant 208 : index
    %52 = vector.load %arg9[%c0_55, %c208] : memref<2x400xf32, #tpu.memory_space<vmem>>, vector<2x16xf32>
    tpu.vector_store %arg9[%c0_55, %c208], %51 {strides = array<i32>} : memref<2x400xf32, #tpu.memory_space<vmem>>, vector<2x16xf32>,
    %c28 = arith.constant 28 : index
    %c0_56 = arith.constant 0 : index
    %53 = vector.load %arg8[%c28, %c0_56] : memref<50x16xf32, #tpu.memory_space<vmem>>, vector<2x16xf32>
    %c0_57 = arith.constant 0 : index
    %c224 = arith.constant 224 : index
    %54 = vector.load %arg9[%c0_57, %c224] : memref<2x400xf32, #tpu.memory_space<vmem>>, vector<2x16xf32>
    tpu.vector_store %arg9[%c0_57, %c224], %53 {strides = array<i32>} : memref<2x400xf32, #tpu.memory_space<vmem>>, vector<2x16xf32>,
    %c30 = arith.constant 30 : index
    %c0_58 = arith.constant 0 : index
    %55 = vector.load %arg8[%c30, %c0_58] : memref<50x16xf32, #tpu.memory_space<vmem>>, vector<2x16xf32>
    %c0_59 = arith.constant 0 : index
    %c240 = arith.constant 240 : index
    %56 = vector.load %arg9[%c0_59, %c240] : memref<2x400xf32, #tpu.memory_space<vmem>>, vector<2x16xf32>
    tpu.vector_store %arg9[%c0_59, %c240], %55 {strides = array<i32>} : memref<2x400xf32, #tpu.memory_space<vmem>>, vector<2x16xf32>,
    %c32_60 = arith.constant 32 : index
    %c0_61 = arith.constant 0 : index
    %57 = vector.load %arg8[%c32_60, %c0_61] : memref<50x16xf32, #tpu.memory_space<vmem>>, vector<2x16xf32>
    %c0_62 = arith.constant 0 : index
    %c256 = arith.constant 256 : index
    %58 = vector.load %arg9[%c0_62, %c256] : memref<2x400xf32, #tpu.memory_space<vmem>>, vector<2x16xf32>
    tpu.vector_store %arg9[%c0_62, %c256], %57 {strides = array<i32>} : memref<2x400xf32, #tpu.memory_space<vmem>>, vector<2x16xf32>,
    %c34 = arith.constant 34 : index
    %c0_63 = arith.constant 0 : index
    %59 = vector.load %arg8[%c34, %c0_63] : memref<50x16xf32, #tpu.memory_space<vmem>>, vector<2x16xf32>
    %c0_64 = arith.constant 0 : index
    %c272 = arith.constant 272 : index
    %60 = vector.load %arg9[%c0_64, %c272] : memref<2x400xf32, #tpu.memory_space<vmem>>, vector<2x16xf32>
    tpu.vector_store %arg9[%c0_64, %c272], %59 {strides = array<i32>} : memref<2x400xf32, #tpu.memory_space<vmem>>, vector<2x16xf32>,
    %c36 = arith.constant 36 : index
    %c0_65 = arith.constant 0 : index
    %61 = vector.load %arg8[%c36, %c0_65] : memref<50x16xf32, #tpu.memory_space<vmem>>, vector<2x16xf32>
    %c0_66 = arith.constant 0 : index
    %c288 = arith.constant 288 : index
    %62 = vector.load %arg9[%c0_66, %c288] : memref<2x400xf32, #tpu.memory_space<vmem>>, vector<2x16xf32>
    tpu.vector_store %arg9[%c0_66, %c288], %61 {strides = array<i32>} : memref<2x400xf32, #tpu.memory_space<vmem>>, vector<2x16xf32>,
    %c38 = arith.constant 38 : index
    %c0_67 = arith.constant 0 : index
    %63 = vector.load %arg8[%c38, %c0_67] : memref<50x16xf32, #tpu.memory_space<vmem>>, vector<2x16xf32>
    %c0_68 = arith.constant 0 : index
    %c304 = arith.constant 304 : index
    %64 = vector.load %arg9[%c0_68, %c304] : memref<2x400xf32, #tpu.memory_space<vmem>>, vector<2x16xf32>
    tpu.vector_store %arg9[%c0_68, %c304], %63 {strides = array<i32>} : memref<2x400xf32, #tpu.memory_space<vmem>>, vector<2x16xf32>,
    %c40 = arith.constant 40 : index
    %c0_69 = arith.constant 0 : index
    %65 = vector.load %arg8[%c40, %c0_69] : memref<50x16xf32, #tpu.memory_space<vmem>>, vector<2x16xf32>
    %c0_70 = arith.constant 0 : index
    %c320 = arith.constant 320 : index
    %66 = vector.load %arg9[%c0_70, %c320] : memref<2x400xf32, #tpu.memory_space<vmem>>, vector<2x16xf32>
    tpu.vector_store %arg9[%c0_70, %c320], %65 {strides = array<i32>} : memref<2x400xf32, #tpu.memory_space<vmem>>, vector<2x16xf32>,
    %c42 = arith.constant 42 : index
    %c0_71 = arith.constant 0 : index
    %67 = vector.load %arg8[%c42, %c0_71] : memref<50x16xf32, #tpu.memory_space<vmem>>, vector<2x16xf32>
    %c0_72 = arith.constant 0 : index
    %c336 = arith.constant 336 : index
    %68 = vector.load %arg9[%c0_72, %c336] : memref<2x400xf32, #tpu.memory_space<vmem>>, vector<2x16xf32>
    tpu.vector_store %arg9[%c0_72, %c336], %67 {strides = array<i32>} : memref<2x400xf32, #tpu.memory_space<vmem>>, vector<2x16xf32>,
    %c44 = arith.constant 44 : index
    %c0_73 = arith.constant 0 : index
    %69 = vector.load %arg8[%c44, %c0_73] : memref<50x16xf32, #tpu.memory_space<vmem>>, vector<2x16xf32>
    %c0_74 = arith.constant 0 : index
    %c352 = arith.constant 352 : index
    %70 = vector.load %arg9[%c0_74, %c352] : memref<2x400xf32, #tpu.memory_space<vmem>>, vector<2x16xf32>
    tpu.vector_store %arg9[%c0_74, %c352], %69 {strides = array<i32>} : memref<2x400xf32, #tpu.memory_space<vmem>>, vector<2x16xf32>,
    %c46 = arith.constant 46 : index
    %c0_75 = arith.constant 0 : index
    %71 = vector.load %arg8[%c46, %c0_75] : memref<50x16xf32, #tpu.memory_space<vmem>>, vector<2x16xf32>
    %c0_76 = arith.constant 0 : index
    %c368 = arith.constant 368 : index
    %72 = vector.load %arg9[%c0_76, %c368] : memref<2x400xf32, #tpu.memory_space<vmem>>, vector<2x16xf32>
    tpu.vector_store %arg9[%c0_76, %c368], %71 {strides = array<i32>} : memref<2x400xf32, #tpu.memory_space<vmem>>, vector<2x16xf32>,
    %c48_77 = arith.constant 48 : index
    %c0_78 = arith.constant 0 : index
    %73 = vector.load %arg8[%c48_77, %c0_78] : memref<50x16xf32, #tpu.memory_space<vmem>>, vector<2x16xf32>
    %c0_79 = arith.constant 0 : index
    %c384 = arith.constant 384 : index
    %74 = vector.load %arg9[%c0_79, %c384] : memref<2x400xf32, #tpu.memory_space<vmem>>, vector<2x16xf32>
    tpu.vector_store %arg9[%c0_79, %c384], %73 {strides = array<i32>} : memref<2x400xf32, #tpu.memory_space<vmem>>, vector<2x16xf32>,
    %c0_80 = arith.constant 0 : index
    %c0_81 = arith.constant 0 : index
    %75 = vector.load %arg9[%c0_80, %c0_81] : memref<2x400xf32, #tpu.memory_space<vmem>>, vector<2x400xf32>
    %76 = arith.truncf %75 : vector<2x400xf32> to vector<2x400xbf16>
    %c0_82 = arith.constant 0 : index
    %c0_83 = arith.constant 0 : index
    %77 = vector.load %arg3[%c0_82, %c0_83] : memref<400x120xbf16, #tpu.memory_space<vmem>>, vector<400x120xbf16>
    %cst_84 = arith.constant dense<0.000000e+00> : vector<2x120xf32>
    %78 = tpu.matmul %76, %77, %cst_84 {dimension_numbers = #tpu.dot_dimension_numbers<[1], [0], [0], [1], [0, 0, 1, 1], [], []>} : vector<2x400xbf16>, vector<400x120xbf16>, vector<2x120xf32> -> vector<2x120xf32>
    %c0_85 = arith.constant 0 : index
    %c0_86 = arith.constant 0 : index
    %79 = vector.load %arg4[%c0_85, %c0_86] : memref<1x120xf32, #tpu.memory_space<vmem>>, vector<1x120xf32>
    %80 = vector.broadcast %79 : vector<1x120xf32> to vector<2x120xf32>
    %81 = arith.addf %78, %80 : vector<2x120xf32>
    %cst_87 = arith.constant 0.000000e+00 : f32
    %82 = vector.broadcast %cst_87 : f32 to vector<2x120xf32>
    %83 = arith.maximumf %81, %82 : vector<2x120xf32>
    %84 = arith.truncf %83 : vector<2x120xf32> to vector<2x120xbf16>
    %c0_88 = arith.constant 0 : index
    %c0_89 = arith.constant 0 : index
    %85 = vector.load %arg5[%c0_88, %c0_89] : memref<120x84xbf16, #tpu.memory_space<vmem>>, vector<120x84xbf16>
    %cst_90 = arith.constant dense<0.000000e+00> : vector<2x84xf32>
    %86 = tpu.matmul %84, %85, %cst_90 {dimension_numbers = #tpu.dot_dimension_numbers<[1], [0], [0], [1], [0, 0, 1, 1], [], []>} : vector<2x120xbf16>, vector<120x84xbf16>, vector<2x84xf32> -> vector<2x84xf32>
    %c0_91 = arith.constant 0 : index
    %c0_92 = arith.constant 0 : index
    %87 = vector.load %arg6[%c0_91, %c0_92] : memref<1x84xf32, #tpu.memory_space<vmem>>, vector<1x84xf32>
    %88 = vector.broadcast %87 : vector<1x84xf32> to vector<2x84xf32>
    %89 = arith.addf %86, %88 : vector<2x84xf32>
    %cst_93 = arith.constant 0.000000e+00 : f32
    %90 = vector.broadcast %cst_93 : f32 to vector<2x84xf32>
    %91 = arith.maximumf %89, %90 : vector<2x84xf32>
    %c0_94 = arith.constant 0 : index
    %c0_95 = arith.constant 0 : index
    %92 = vector.load %arg7[%c0_94, %c0_95] : memref<2x84xf32, #tpu.memory_space<vmem>>, vector<2x84xf32>
    tpu.vector_store %arg7[%c0_94, %c0_95], %91 {strides = array<i32>} : memref<2x84xf32, #tpu.memory_space<vmem>>, vector<2x84xf32>,
    return
  }
}

</mosaic_0001>

<bundles_post_ra>
// kernel: conv_module_forward.2
= control target key start
LH: loop header
LB: loop body
LE: loop exit
PB: predicated region body
PF: predicated region fallthrough
CT: control target
= control target key end

     0   :  { %vm136_vm0 = vcmask 1044480   ;;  %vm137_vm1 = vcmask 1045504   ;;  %v1193_v1 = vmov 0   ;;  %v1194_v2 = vmov 65535   ;;  %s1512_s0 = inlined_call_operand.vmem [shape: bf16[4,75,392], index: 0, kind: input, shape index: {}]   ;;  %s1513_s1 = inlined_call_operand.vmem [shape: bf16[6,75], index: 1, kind: input, shape index: {}]   ;;  %s1514_s2 = inlined_call_operand.vmem [shape: f32[6,1], index: 2, kind: input, shape index: {}]   ;;  %s1515_s3 = inlined_call_operand.vmem [shape: bf16[6,392], index: 3, kind: output, shape index: {}]  }
   0x1   :  { %v1073_v0 = vld [vmem:[%s1512_s0 + $0x84] ss:$16 sps:$4 sm:$0x3f]   ;;  %184 = vmatprep.mubr.bf16.mxu0 %v1193_v1  ;;  %225 = vmatprep.mubr.bf16.mxu1 %v1193_v1  ;;  %v138_v3 = vsel %vm136_vm0, 4294967295, %v1194_v2  ;;  %v1081_v11 = vld [vmem:[%s1512_s0 + $0x6c] ss:$16 sps:$4 sm:$0xff]  }
   0x2   :  { %1072 = vset.pattern.permute.xlu0 %v1193_v1  ;;  %v1221_v4 = vsel %vm137_vm1, %v138_v3, 0  ;;  %v1075_v5 = vld [vmem:[%s1512_s0 + $0x8c] ss:$16 sps:$4 sm:$0x3f]   ;;  %v1079_v10 = vld [vmem:[%s1512_s0 + $0x64] ss:$16 sps:$4 sm:$0xff]  }
   0x3   :  { %v144_v6 = vand.u32 %v1073_v0, %v1221_v4  ;;  %v1077_v7 = vld [vmem:[%s1512_s0 + $0x80] ss:$16 sps:$4 sm:$0x3f]   ;;  %v1078_v8 = vld [vmem:[%s1512_s0 + $0x88] ss:$16 sps:$4 sm:$0x3f]   ;;  %v150_v9 = vand.u32 %v1075_v5, %v1221_v4 }
   0x4   :  { %v141_v12 = vand.u32 %v1077_v7, %v1221_v4  ;;  %v147_v13 = vand.u32 %v1078_v8, %v1221_v4  ;;  %v1083_v14 = vld [vmem:[%s1512_s0 + $0x60] ss:$16 sps:$4 sm:$0xff]   ;;  %v1084_v15 = vld [vmem:[%s1512_s0 + $0x68] ss:$16 sps:$4 sm:$0xff]   ;;  %v1085_v16 = vld [vmem:[%s1512_s0 + $0x44] ss:$16 sps:$4 sm:$0xff]  }
   0x5   :  { %158 = vmatprep.subr.bf16.mxu0 %v144_v6  ;;  %199 = vmatprep.subr.bf16.mxu1 %v150_v9  ;;  %v1087_v17 = vld [vmem:[%s1512_s0 + $0x4c] ss:$16 sps:$4 sm:$0xff]   ;;  %v1089_v18 = vld [vmem:[%s1512_s0 + $0x40] ss:$16 sps:$4 sm:$0xff]   ;;  %v1090_v19 = vld [vmem:[%s1512_s0 + $0x48] ss:$16 sps:$4 sm:$0xff]  }
   0x6   :  { %159 = vmatpush1.bf16.msra.mxu0 %v141_v12  ;;  %200 = vmatpush1.bf16.msra.mxu1 %v147_v13  ;;  %v1091_v20 = vld [vmem:[%s1512_s0 + $0x24] ss:$16 sps:$4 sm:$0xff]   ;;  %v1093_v21 = vld [vmem:[%s1512_s0 + $0x2c] ss:$16 sps:$4 sm:$0xff]   ;;  %v1095_v22 = vld [vmem:[%s1512_s0 + $0x20] ss:$16 sps:$4 sm:$0xff]  }
   0x7   :  { %160 = vmatprep.subr.bf16.mxu0 %v1079_v10  ;;  %201 = vmatprep.subr.bf16.mxu1 %v1081_v11  ;;  %v1096_v23 = vld [vmem:[%s1512_s0 + $0x28] ss:$16 sps:$4 sm:$0xff]   ;;  %v1097_v24 = vld [vmem:[%s1512_s0 + $0x4] ss:$16 sps:$4 sm:$0xff]   ;;  %v1099_v25 = vld [vmem:[%s1512_s0 + $0xc] ss:$16 sps:$4 sm:$0xff]  }
   0x8   :  { %v1105_v26 = vld [vmem:[%s1512_s0 + $0x124] ss:$16 sps:$4 sm:$0x3f]   ;;  %v1108_v27 = vld [vmem:[%s1512_s0 + $0x12c] ss:$16 sps:$4 sm:$0x3f]  }
   0x9   :  { %v1101_v28 = vld [vmem:[%s1512_s0] ss:$16 sps:$4 sm:$0xff]   ;;  %v1102_v30 = vld [vmem:[%s1512_s0 + $0x8] ss:$16 sps:$4 sm:$0xff]   ;;  %v355_v32 = vand.u32 %v1105_v26, %v1221_v4  ;;  %v361_v33 = vand.u32 %v1108_v27, %v1221_v4  ;;  %vm132_vm2 = vcmask 613376   ;;  %vm910_vm3 = vcmask 1042432  }
   0xa   :  { %161 = vmatpush1.bf16.msra.mxu0 %v1083_v14  ;;  %202 = vmatpush1.bf16.msra.mxu1 %v1084_v15  ;;  %v1103_v29 = vld [vmem:[%s1512_s0 + $0x120] ss:$16 sps:$4 sm:$0x3f]   ;;  %v1106_v31 = vld [vmem:[%s1512_s0 + $0x128] ss:$16 sps:$4 sm:$0x3f]  }
   0xb   :  { %162 = vmatprep.subr.bf16.mxu0 %v1085_v16  ;;  %203 = vmatprep.subr.bf16.mxu1 %v1087_v17  ;;  %v1301_v34 = vld [vmem:[%s1513_s1] sm:$0x7]  ;;  %v352_v35 = vand.u32 %v1103_v29, %v1221_v4  ;;  %v358_v36 = vand.u32 %v1106_v31, %v1221_v4  ;;  %v1111_v37 = vld [vmem:[%s1512_s0 + $0x104] ss:$16 sps:$4 sm:$0xff]   ;;  %v1114_v38 = vld [vmem:[%s1512_s0 + $0x10c] ss:$16 sps:$4 sm:$0xff]  }
   0xc   :  { %v1109_v39 = vld [vmem:[%s1512_s0 + $0x100] ss:$16 sps:$4 sm:$0xff]   ;;  %v1112_v40 = vld [vmem:[%s1512_s0 + $0x108] ss:$16 sps:$4 sm:$0xff]   ;;  %v1117_v41 = vld [vmem:[%s1512_s0 + $0xe4] ss:$16 sps:$4 sm:$0xff]  }
   0xd   :  { %v1120_v42 = vld [vmem:[%s1512_s0 + $0xec] ss:$16 sps:$4 sm:$0xff]   ;;  %v1115_v43 = vld [vmem:[%s1512_s0 + $0xe0] ss:$16 sps:$4 sm:$0xff]   ;;  %v1118_v44 = vld [vmem:[%s1512_s0 + $0xe8] ss:$16 sps:$4 sm:$0xff]  }
   0xe   :  { %163 = vmatpush1.bf16.msra.mxu0 %v1089_v18  ;;  %204 = vmatpush1.bf16.msra.mxu1 %v1090_v19  ;;  %v1123_v45 = vld [vmem:[%s1512_s0 + $0xc4] ss:$16 sps:$4 sm:$0xff]   ;;  %v1126_v46 = vld [vmem:[%s1512_s0 + $0xcc] ss:$16 sps:$4 sm:$0xff]   ;;  %v1121_v47 = vld [vmem:[%s1512_s0 + $0xc0] ss:$16 sps:$4 sm:$0xff]  }
   0xf   :  { %164 = vmatprep.subr.bf16.mxu0 %v1091_v20  ;;  %205 = vmatprep.subr.bf16.mxu1 %v1093_v21  ;;  %v1124_v48 = vld [vmem:[%s1512_s0 + $0xc8] ss:$16 sps:$4 sm:$0xff]   ;;  %v1129_v49 = vld [vmem:[%s1512_s0 + $0xa4] ss:$16 sps:$4 sm:$0xff]   ;;  %v1132_v50 = vld [vmem:[%s1512_s0 + $0xac] ss:$16 sps:$4 sm:$0xff]  }
  0x10   :  { %v1135_v51 = vld [vmem:[%s1512_s0 + $0x1c4] ss:$16 sps:$4 sm:$0x3f]   ;;  %v1138_v52 = vld [vmem:[%s1512_s0 + $0x1cc] ss:$16 sps:$4 sm:$0x3f]  }
  0x11   :  { %v1127_v53 = vld [vmem:[%s1512_s0 + $0xa0] ss:$16 sps:$4 sm:$0xff]   ;;  %v1130_v55 = vld [vmem:[%s1512_s0 + $0xa8] ss:$16 sps:$4 sm:$0xff]   ;;  %v570_v57 = vand.u32 %v1135_v51, %v1221_v4  ;;  %v576_v58 = vand.u32 %v1138_v52, %v1221_v4  ;;  %v1141_v61 = vld [vmem:[%s1512_s0 + $0x1a4] ss:$16 sps:$4 sm:$0xff]  }
  0x12   :  { %165 = vmatpush1.bf16.msra.mxu0 %v1095_v22  ;;  %206 = vmatpush1.bf16.msra.mxu1 %v1096_v23  ;;  %v1133_v54 = vld [vmem:[%s1512_s0 + $0x1c0] ss:$16 sps:$4 sm:$0x3f]   ;;  %v1136_v56 = vld [vmem:[%s1512_s0 + $0x1c8] ss:$16 sps:$4 sm:$0x3f]  }
  0x13   :  { %166 = vmatprep.subr.bf16.mxu0 %v1097_v24  ;;  %207 = vmatprep.subr.bf16.mxu1 %v1099_v25  ;;  %v567_v59 = vand.u32 %v1133_v54, %v1221_v4  ;;  %v573_v60 = vand.u32 %v1136_v56, %v1221_v4  ;;  %v1144_v62 = vld [vmem:[%s1512_s0 + $0x1ac] ss:$16 sps:$4 sm:$0xff]   ;;  %v1139_v63 = vld [vmem:[%s1512_s0 + $0x1a0] ss:$16 sps:$4 sm:$0xff]   ;;  %v1142_v0 = vld [vmem:[%s1512_s0 + $0x1a8] ss:$16 sps:$4 sm:$0xff]  }
  0x14   :  { %v1147_v2 = vld [vmem:[%s1512_s0 + $0x184] ss:$16 sps:$4 sm:$0xff]   ;;  %v1150_v3 = vld [vmem:[%s1512_s0 + $0x18c] ss:$16 sps:$4 sm:$0xff]   ;;  %v1145_v5 = vld [vmem:[%s1512_s0 + $0x180] ss:$16 sps:$4 sm:$0xff]  }
  0x15   :  { %v1148_v6 = vld [vmem:[%s1512_s0 + $0x188] ss:$16 sps:$4 sm:$0xff]   ;;  %v1153_v7 = vld [vmem:[%s1512_s0 + $0x164] ss:$16 sps:$4 sm:$0xff]   ;;  %v1156_v8 = vld [vmem:[%s1512_s0 + $0x16c] ss:$16 sps:$4 sm:$0xff]  }
  0x16   :  { %167 = vmatpush1.bf16.msra.mxu0 %v1101_v28  ;;  %208 = vmatpush1.bf16.msra.mxu1 %v1102_v30  ;;  %v1151_v9 = vld [vmem:[%s1512_s0 + $0x160] ss:$16 sps:$4 sm:$0xff]   ;;  %v1154_v10 = vld [vmem:[%s1512_s0 + $0x168] ss:$16 sps:$4 sm:$0xff]   ;;  %v1159_v11 = vld [vmem:[%s1512_s0 + $0x144] ss:$16 sps:$4 sm:$0xff]  }
  0x17   :  { %369 = vmatprep.subr.bf16.mxu0 %v355_v32  ;;  %410 = vmatprep.subr.bf16.mxu1 %v361_v33  ;;  %v1162_v12 = vld [vmem:[%s1512_s0 + $0x14c] ss:$16 sps:$4 sm:$0xff]   ;;  %v879_v13 = vld [vmem:[%s1514_s2] sm:$0x3f]  ;;  %v1160_v17 = vld [vmem:[%s1512_s0 + $0x148] ss:$16 sps:$4 sm:$0xff]  }
  0x18   :  { %v1165_v14 = vld [vmem:[%s1512_s0 + $0x264] ss:$16 sps:$4 sm:$0x3f]   ;;  %v1168_v15 = vld [vmem:[%s1512_s0 + $0x26c] ss:$16 sps:$4 sm:$0x3f]   ;;  %882 = vperm.xlu0 %1072, %v879_v13  }
  0x19   :  { %938 = vmatmul.mubr.msk.bf16.vlgmr.msra.gmra.mxu0 %vm132_vm2, %v1301_v34  ;;  %939 = vmatmul.mubr.msk.bf16.vlgmr.msra.gmra.mxu1 %vm132_vm2, %v1301_v34  ;;  %v1157_v16 = vld [vmem:[%s1512_s0 + $0x140] ss:$16 sps:$4 sm:$0xff]   ;;  %v1166_v19 = vld [vmem:[%s1512_s0 + $0x268] ss:$16 sps:$4 sm:$0x3f]   ;;  %v785_v20 = vand.u32 %v1165_v14, %v1221_v4  ;;  %v791_v21 = vand.u32 %v1168_v15, %v1221_v4  ;;  %vm911_vm4 = vcmask 63492  }
  0x1a   :  { %370 = vmatpush1.bf16.msra.mxu0 %v352_v35  ;;  %411 = vmatpush1.bf16.msra.mxu1 %v358_v36  ;;  %v1163_v18 = vld [vmem:[%s1512_s0 + $0x260] ss:$16 sps:$4 sm:$0x3f]   ;;  %v788_v23 = vand.u32 %v1166_v19, %v1221_v4  ;;  %v1171_v24 = vld [vmem:[%s1512_s0 + $0x244] ss:$16 sps:$4 sm:$0xff]   ;;  %vm912_vm5 = vmor %vm911_vm4, %vm910_vm3 }
  0x1b   :  { %371 = vmatprep.subr.bf16.mxu0 %v1111_v37  ;;  %412 = vmatprep.subr.bf16.mxu1 %v1114_v38  ;;  %v782_v22 = vand.u32 %v1163_v18, %v1221_v4  ;;  %v1174_v25 = vld [vmem:[%s1512_s0 + $0x24c] ss:$16 sps:$4 sm:$0xff]   ;;  %v1169_v4 = vld [vmem:[%s1512_s0 + $0x240] ss:$16 sps:$4 sm:$0xff]   ;;  %v1172_v26 = vld [vmem:[%s1512_s0 + $0x248] ss:$16 sps:$4 sm:$0xff]  }
  0x1c   :  { %395 = vmatprep.mubr.bf16.mxu0 %v1193_v1  ;;  %436 = vmatprep.mubr.bf16.mxu1 %v1193_v1  ;;  %v1177_v27 = vld [vmem:[%s1512_s0 + $0x224] ss:$16 sps:$4 sm:$0xff]   ;;  %v1180_v28 = vld [vmem:[%s1512_s0 + $0x22c] ss:$16 sps:$4 sm:$0xff]   ;;  %v1175_v29 = vld [vmem:[%s1512_s0 + $0x220] ss:$16 sps:$4 sm:$0xff]  }
  0x1d   :  { %v1178_v30 = vld [vmem:[%s1512_s0 + $0x228] ss:$16 sps:$4 sm:$0xff]   ;;  %v1183_v31 = vld [vmem:[%s1512_s0 + $0x204] ss:$16 sps:$4 sm:$0xff]   ;;  %v1181_v32 = vld [vmem:[%s1512_s0 + $0x200] ss:$16 sps:$4 sm:$0xff]  }
  0x1e   :  { %372 = vmatpush1.bf16.msra.mxu0 %v1109_v39  ;;  %413 = vmatpush1.bf16.msra.mxu1 %v1112_v40  ;;  %v1184_v33 = vld [vmem:[%s1512_s0 + $0x208] ss:$16 sps:$4 sm:$0xff]   ;;  %v1189_v35 = vld [vmem:[%s1512_s0 + $0x1e4] ss:$16 sps:$4 sm:$0xff]   ;;  %v1192_v36 = vld [vmem:[%s1512_s0 + $0x1ec] ss:$16 sps:$4 sm:$0xff]  }
  0x1f   :  { %373 = vmatprep.subr.bf16.mxu0 %v1117_v41  ;;  %414 = vmatprep.subr.bf16.mxu1 %v1120_v42  ;;  %v1187_v37 = vld [vmem:[%s1512_s0 + $0x1e0] ss:$16 sps:$4 sm:$0xff]   ;;  %v1190_v38 = vld [vmem:[%s1512_s0 + $0x1e8] ss:$16 sps:$4 sm:$0xff]  }
  0x22   :  { %374 = vmatpush1.bf16.msra.mxu0 %v1115_v43  ;;  %415 = vmatpush1.bf16.msra.mxu1 %v1118_v44 }
  0x23   :  { %375 = vmatprep.subr.bf16.mxu0 %v1123_v45  ;;  %416 = vmatprep.subr.bf16.mxu1 %v1126_v46 }
  0x26   :  { %376 = vmatpush1.bf16.msra.mxu0 %v1121_v47  ;;  %417 = vmatpush1.bf16.msra.mxu1 %v1124_v48 }
  0x27   :  { %377 = vmatprep.subr.bf16.mxu0 %v1129_v49  ;;  %418 = vmatprep.subr.bf16.mxu1 %v1132_v50 }
  0x2a   :  { %378 = vmatpush1.bf16.msra.mxu0 %v1127_v53  ;;  %419 = vmatpush1.bf16.msra.mxu1 %v1130_v55 }
  0x2b   :  { %584 = vmatprep.subr.bf16.mxu0 %v570_v57  ;;  %625 = vmatprep.subr.bf16.mxu1 %v576_v58 }
  0x2d   :  { %980 = vmatmul.mubr.msk.bf16.vlgmr.msra.gmra.mxu0 %vm132_vm2, %v1301_v34  ;;  %981 = vmatmul.mubr.msk.bf16.vlgmr.msra.gmra.mxu1 %vm132_vm2, %v1301_v34 }
  0x2e   :  { %585 = vmatpush1.bf16.msra.mxu0 %v567_v59  ;;  %626 = vmatpush1.bf16.msra.mxu1 %v573_v60 }
  0x2f   :  { %586 = vmatprep.subr.bf16.mxu0 %v1141_v61  ;;  %627 = vmatprep.subr.bf16.mxu1 %v1144_v62 }
  0x30   :  { %610 = vmatprep.mubr.bf16.mxu0 %v1193_v1  ;;  %651 = vmatprep.mubr.bf16.mxu1 %v1193_v1 }
  0x32   :  { %587 = vmatpush1.bf16.msra.mxu0 %v1139_v63  ;;  %628 = vmatpush1.bf16.msra.mxu1 %v1142_v0 }
  0x33   :  { %588 = vmatprep.subr.bf16.mxu0 %v1147_v2  ;;  %629 = vmatprep.subr.bf16.mxu1 %v1150_v3 }
  0x36   :  { %589 = vmatpush1.bf16.msra.mxu0 %v1145_v5  ;;  %630 = vmatpush1.bf16.msra.mxu1 %v1148_v6 }
  0x37   :  { %590 = vmatprep.subr.bf16.mxu0 %v1153_v7  ;;  %631 = vmatprep.subr.bf16.mxu1 %v1156_v8 }
  0x3a   :  { %591 = vmatpush1.bf16.msra.mxu0 %v1151_v9  ;;  %632 = vmatpush1.bf16.msra.mxu1 %v1154_v10 }
  0x3b   :  { %592 = vmatprep.subr.bf16.mxu0 %v1159_v11  ;;  %633 = vmatprep.subr.bf16.mxu1 %v1162_v12 }
  0x3e   :  { %593 = vmatpush1.bf16.msra.mxu0 %v1157_v16  ;;  %634 = vmatpush1.bf16.msra.mxu1 %v1160_v17 }
  0x3f   :  { %799 = vmatprep.subr.bf16.mxu0 %v785_v20  ;;  %840 = vmatprep.subr.bf16.mxu1 %v791_v21 }
  0x41   :  { %1022 = vmatmul.mubr.msk.bf16.vlgmr.msra.gmra.mxu0 %vm132_vm2, %v1301_v34  ;;  %1023 = vmatmul.mubr.msk.bf16.vlgmr.msra.gmra.mxu1 %vm132_vm2, %v1301_v34 }
  0x42   :  { %800 = vmatpush1.bf16.msra.mxu0 %v782_v22  ;;  %841 = vmatpush1.bf16.msra.mxu1 %v788_v23 }
  0x43   :  { %801 = vmatprep.subr.bf16.mxu0 %v1171_v24  ;;  %842 = vmatprep.subr.bf16.mxu1 %v1174_v25 }
  0x44   :  { %825 = vmatprep.mubr.bf16.mxu0 %v1193_v1  ;;  %866 = vmatprep.mubr.bf16.mxu1 %v1193_v1  ;;  %v1186_v1 = vld [vmem:[%s1512_s0 + $0x20c] ss:$16 sps:$4 sm:$0xff]  }
  0x46   :  { %802 = vmatpush1.bf16.msra.mxu0 %v1169_v4  ;;  %843 = vmatpush1.bf16.msra.mxu1 %v1172_v26 }
  0x47   :  { %803 = vmatprep.subr.bf16.mxu0 %v1177_v27  ;;  %844 = vmatprep.subr.bf16.mxu1 %v1180_v28 }
  0x4a   :  { %804 = vmatpush1.bf16.msra.mxu0 %v1175_v29  ;;  %845 = vmatpush1.bf16.msra.mxu1 %v1178_v30 }
  0x4b   :  { %805 = vmatprep.subr.bf16.mxu0 %v1183_v31  ;;  %846 = vmatprep.subr.bf16.mxu1 %v1186_v1 }
  0x4e   :  { %806 = vmatpush1.bf16.msra.mxu0 %v1181_v32  ;;  %847 = vmatpush1.bf16.msra.mxu1 %v1184_v33 }
  0x4f   :  { %807 = vmatprep.subr.bf16.mxu0 %v1189_v35  ;;  %848 = vmatprep.subr.bf16.mxu1 %v1192_v36 }
  0x52   :  { %808 = vmatpush1.bf16.msra.mxu0 %v1187_v37  ;;  %849 = vmatpush1.bf16.msra.mxu1 %v1190_v38 }
  0x55   :  { %1064 = vmatmul.mubr.msk.bf16.vlgmr.msra.gmra.mxu0 %vm132_vm2, %v1301_v34  ;;  %1065 = vmatmul.mubr.msk.bf16.vlgmr.msra.gmra.mxu1 %vm132_vm2, %v1301_v34 }
  0x93   :  { %v883_v6 = vpop.permute.xlu0 %882 }
  0xd9   :  { %v186_v39 = vpop.f32.mrf.mxu0  ;;  %v227_v40 = vpop.f32.mrf.mxu1 }
  0xdb   :  { %v188_v41 = vpop.f32.mrf.mxu0  ;;  %v229_v42 = vpop.f32.mrf.mxu1 }
  0xdd   :  { %v190_v43 = vpop.f32.mrf.mxu0  ;;  %v231_v44 = vpop.f32.mrf.mxu1 }
  0xdf   :  { %v191_v45 = vpop.f32.mrf.mxu0  ;;  %v232_v46 = vpop.f32.mrf.mxu1 }
  0xed   :  { %v397_v47 = vpop.f32.mrf.mxu0  ;;  %v438_v48 = vpop.f32.mrf.mxu1 }
  0xee   :  { %v445_v62 = vmax.f32 %v186_v39, %v397_v47  ;;  %v447_v63 = vmax.f32 %v227_v40, %v438_v48 }
  0xef   :  { %v399_v49 = vpop.f32.mrf.mxu0  ;;  %v440_v50 = vpop.f32.mrf.mxu1 }
  0xf0   :  { %v446_v0 = vmax.f32 %v188_v41, %v399_v49  ;;  %v448_v2 = vmax.f32 %v229_v42, %v440_v50 }
  0xf1   :  { %v401_v51 = vpop.f32.mrf.mxu0  ;;  %v442_v52 = vpop.f32.mrf.mxu1 }
  0xf3   :  { %v402_v53 = vpop.f32.mrf.mxu0  ;;  %v443_v54 = vpop.f32.mrf.mxu1 }
 0x101   :  { %v612_v55 = vpop.f32.mrf.mxu0  ;;  %v653_v56 = vpop.f32.mrf.mxu1 }
 0x102   :  { %v660_v3 = vmax.f32 %v445_v62, %v612_v55  ;;  %v662_v5 = vmax.f32 %v447_v63, %v653_v56 }
 0x103   :  { %v614_v57 = vpop.f32.mrf.mxu0  ;;  %v655_v34 = vpop.f32.mrf.mxu1 }
 0x104   :  { %v661_v9 = vmax.f32 %v446_v0, %v614_v57  ;;  %v663_v10 = vmax.f32 %v448_v2, %v655_v34 }
 0x105   :  { %v616_v58 = vpop.f32.mrf.mxu0  ;;  %v657_v59 = vpop.f32.mrf.mxu1 }
 0x107   :  { %v617_v60 = vpop.f32.mrf.mxu0  ;;  %v658_v61 = vpop.f32.mrf.mxu1 }
 0x115   :  { %v827_v7 = vpop.f32.mrf.mxu0  ;;  %v868_v8 = vpop.f32.mrf.mxu1 }
 0x116   :  { %v875_v11 = vmax.f32 %v660_v3, %v827_v7  ;;  %v877_v12 = vmax.f32 %v662_v5, %v868_v8 }
 0x117   :  { %v829_v13 = vpop.f32.mrf.mxu0  ;;  %v870_v14 = vpop.f32.mrf.mxu1 }
 0x118   :  { %v885_v15 = vadd.f32 %v883_v6, %v875_v11  ;;  %v887_v16 = vadd.f32 %v883_v6, %v877_v12  ;;  %v876_v17 = vmax.f32 %v661_v9, %v829_v13  ;;  %v878_v18 = vmax.f32 %v663_v10, %v870_v14 }
 0x119   :  { %v831_v19 = vpop.f32.mrf.mxu0  ;;  %v872_v20 = vpop.f32.mrf.mxu1 }
 0x11a   :  { %v886_v21 = vadd.f32 %v883_v6, %v876_v17  ;;  %v888_v22 = vadd.f32 %v883_v6, %v878_v18  ;;  %v889_v25 = vmax.f32 %v885_v15, 0.0  ;;  %v891_v4 = vmax.f32 %v887_v16, 0.0 }
 0x11b   :  { %v832_v23 = vpop.f32.mrf.mxu0  ;;  %v873_v24 = vpop.f32.mrf.mxu1 }
 0x11c   :  { %v890_v26 = vmax.f32 %v886_v21, 0.0  ;;  %v892_v27 = vmax.f32 %v888_v22, 0.0 }
 0x11e   :  { %v1068_v28 = vpack.c.bf16 %v890_v26, %v889_v25  ;;  %v1069_v29 = vpack.c.bf16 %v892_v27, %v891_v4 }
 0x120   :  { %909 = vst [vmem:[%s1515_s3] sm:$0x77] %v1068_v28  ;;  %913 = vst.msk [vmem:[%s1515_s3 + $0x8] sm:$0x77] %vm912_vm5, %v1069_v29 }

// kernel: conv_module_forward.3
= control target key start
LH: loop header
LB: loop body
LE: loop exit
PB: predicated region body
PF: predicated region fallthrough
CT: control target
= control target key end

     0   :  { %v1677_v1 = vmov 0   ;;  %vm144_vm0 = vcmask 179200   ;;  %vm157_vm1 = vcmask 1042432   ;;  %s2166_s0 = inlined_call_operand.vmem [shape: bf16[4,50,150], index: 0, kind: input, shape index: {}]   ;;  %s2167_s1 = inlined_call_operand.vmem [shape: bf16[150,16], index: 1, kind: input, shape index: {}]   ;;  %s2168_s2 = inlined_call_operand.vmem [shape: f32[1,16], index: 2, kind: input, shape index: {}]   ;;  %s2169_s3 = inlined_call_operand.vmem [shape: bf16[400,120], index: 3, kind: input, shape index: {}]   ;;  %s2170_s4 = inlined_call_operand.vmem [shape: f32[1,120], index: 4, kind: input, shape index: {}]   ;;  %s2171_s5 = inlined_call_operand.vmem [shape: bf16[120,84], index: 5, kind: input, shape index: {}]   ;;  %s2172_s6 = inlined_call_operand.vmem [shape: f32[1,84], index: 6, kind: input, shape index: {}]   ;;  %s2173_s7 = inlined_call_operand.hbm [shape: f32[2,84], index: 7, kind: output, shape index: {}]  }
   0x1   :  { %v1732_v0 = vld [vmem:[%s2167_s1 + $0x38] sm:$0xff]   ;;  %161 = vmatprep.subr.bf16.mxu0 %v1677_v1  ;;  %278 = vmatprep.subr.bf16.mxu1 %v1677_v1  ;;  %v1741_v2 = vld [vmem:[%s2167_s1 + $0x30] sm:$0xff]   ;;  %v1750_v3 = vld [vmem:[%s2167_s1 + $0x28] sm:$0xff]  }
   0x2   :  { %162 = vmatpush1.bf16.msra.mxu0 %v1732_v0  ;;  %279 = vmatpush1.bf16.msra.mxu1 %v1732_v0  ;;  %v1759_v4 = vld [vmem:[%s2167_s1 + $0x20] sm:$0xff]   ;;  %v1775_v7 = vld [vmem:[%s2167_s1 + $0x18] sm:$0xff]   ;;  %v1785_v8 = vld [vmem:[%s2167_s1 + $0x10] sm:$0xff]  }
   0x3   :  { %163 = vmatprep.subr.bf16.mxu0 %v1677_v1  ;;  %280 = vmatprep.subr.bf16.mxu1 %v1677_v1  ;;  %v1579_v5 = vld [vmem:[%s2166_s0 + $0x4] ss:$8 sps:$4 sm:$0xff]   ;;  %v1575_v10 = vld [vmem:[%s2167_s1 + $0x48] ss:$0 sps:$4 sm:$0x77]  }
   0x4   :  { %1384 = vmatprep.mubr.msk.bf16.mxu0 %vm144_vm0, %v1579_v5  ;;  %v1582_v6 = vld [vmem:[%s2166_s0 + $0x3c] ss:$8 sps:$4 sm:$0xff]   ;;  %v1792_v9 = vld [vmem:[%s2167_s1 + $0x8] sm:$0xff]   ;;  %v1808_v12 = vsel %vm157_vm1, %v1575_v10, 0  ;;  %v1580_v15 = vld [vmem:[%s2166_s0 + $0x38] ss:$8 sps:$4 sm:$0xff]  }
   0x5   :  { %1403 = vmatprep.mubr.msk.bf16.mxu1 %vm144_vm0, %v1582_v6  ;;  %v1806_v11 = vld [vmem:[%s2167_s1] sm:$0xff]   ;;  %v1583_v16 = vld [vmem:[%s2166_s0 + $0x14] ss:$8 sps:$4 sm:$0xff]   ;;  %v1585_v18 = vld [vmem:[%s2166_s0 + $0x10] ss:$8 sps:$4 sm:$0xff]  }
   0x6   :  { %164 = vmatpush1.bf16.msra.mxu0 %v1741_v2  ;;  %281 = vmatpush1.bf16.msra.mxu1 %v1741_v2  ;;  %v1819_v13 = vld [vmem:[%s2167_s1 + $0x40] sm:$0xff]   ;;  %v1586_v17 = vld [vmem:[%s2166_s0 + $0x4c] ss:$8 sps:$4 sm:$0xff]   ;;  %v1588_v19 = vld [vmem:[%s2166_s0 + $0x48] ss:$8 sps:$4 sm:$0xff]  }
   0x7   :  { %165 = vmatprep.subr.bf16.mxu0 %v1677_v1  ;;  %282 = vmatprep.subr.bf16.mxu1 %v1677_v1  ;;  %v1577_v14 = vld [vmem:[%s2166_s0] ss:$8 sps:$4 sm:$0xff]   ;;  %v1589_v20 = vld [vmem:[%s2166_s0 + $0x24] ss:$8 sps:$4 sm:$0xff]  }
   0x8   :  { %v1592_v21 = vld [vmem:[%s2166_s0 + $0x5c] ss:$8 sps:$4 sm:$0xff]  }
   0xa   :  { %166 = vmatpush1.bf16.msra.mxu0 %v1750_v3  ;;  %283 = vmatpush1.bf16.msra.mxu1 %v1750_v3 }
   0xb   :  { %167 = vmatprep.subr.bf16.mxu0 %v1677_v1  ;;  %284 = vmatprep.subr.bf16.mxu1 %v1677_v1 }
   0xe   :  { %168 = vmatpush1.bf16.msra.mxu0 %v1759_v4  ;;  %285 = vmatpush1.bf16.msra.mxu1 %v1759_v4 }
   0xf   :  { %169 = vmatprep.subr.bf16.mxu0 %v1677_v1  ;;  %286 = vmatprep.subr.bf16.mxu1 %v1677_v1 }
  0x12   :  { %170 = vmatpush1.bf16.msra.mxu0 %v1775_v7  ;;  %287 = vmatpush1.bf16.msra.mxu1 %v1775_v7 }
  0x13   :  { %171 = vmatprep.subr.bf16.mxu0 %v1677_v1  ;;  %288 = vmatprep.subr.bf16.mxu1 %v1677_v1 }
  0x16   :  { %172 = vmatpush1.bf16.msra.mxu0 %v1785_v8  ;;  %289 = vmatpush1.bf16.msra.mxu1 %v1785_v8 }
  0x17   :  { %173 = vmatprep.subr.bf16.mxu0 %v1677_v1  ;;  %290 = vmatprep.subr.bf16.mxu1 %v1677_v1 }
  0x1a   :  { %174 = vmatpush1.bf16.msra.mxu0 %v1792_v9  ;;  %291 = vmatpush1.bf16.msra.mxu1 %v1792_v9 }
  0x1b   :  { %175 = vmatprep.subr.bf16.mxu0 %v1677_v1  ;;  %292 = vmatprep.subr.bf16.mxu1 %v1677_v1 }
  0x1e   :  { %176 = vmatpush1.bf16.msra.mxu0 %v1806_v11  ;;  %293 = vmatpush1.bf16.msra.mxu1 %v1806_v11 }
  0x1f   :  { %189 = vmatprep.subr.bf16.mxu0 %v1677_v1  ;;  %306 = vmatprep.subr.bf16.mxu1 %v1677_v1 }
  0x22   :  { %190 = vmatpush2.bf16.msra.mxu0 %v1808_v12  ;;  %307 = vmatpush2.bf16.msra.mxu1 %v1808_v12 }
  0x23   :  { %191 = vmatprep.subr.bf16.mxu0 %v1677_v1  ;;  %308 = vmatprep.subr.bf16.mxu1 %v1677_v1 }
  0x26   :  { %192 = vmatpush2.bf16.msra.mxu0 %v1819_v13  ;;  %309 = vmatpush2.bf16.msra.mxu1 %v1819_v13 }
  0x27   :  { %402 = vmatprep.subr.bf16.mxu0 %v1677_v1  ;;  %526 = vmatprep.subr.bf16.mxu1 %v1677_v1 }
  0x29   :  { %194 = vmatmul.mubr.bf16.vlgmr.msra.gmra.mxu0 %v1577_v14  ;;  %311 = vmatmul.mubr.bf16.vlgmr.msra.gmra.mxu1 %v1580_v15 }
  0x2a   :  { %403 = vmatpush1.bf16.msra.mxu0 %v1732_v0  ;;  %527 = vmatpush1.bf16.msra.mxu1 %v1732_v0 }
  0x2b   :  { %404 = vmatprep.subr.bf16.mxu0 %v1677_v1  ;;  %528 = vmatprep.subr.bf16.mxu1 %v1677_v1 }
  0x2c   :  { %1385 = vmatprep.mubr.msk.bf16.mxu0 %vm144_vm0, %v1583_v16  ;;  %1404 = vmatprep.mubr.msk.bf16.mxu1 %vm144_vm0, %v1586_v17 }
  0x2e   :  { %405 = vmatpush1.bf16.msra.mxu0 %v1741_v2  ;;  %529 = vmatpush1.bf16.msra.mxu1 %v1741_v2 }
  0x2f   :  { %406 = vmatprep.subr.bf16.mxu0 %v1677_v1  ;;  %530 = vmatprep.subr.bf16.mxu1 %v1677_v1 }
  0x30   :  { %12 = vsyncpa [#allocation5], 0  ;;  %v1591_v22 = vld [vmem:[%s2166_s0 + $0x20] ss:$8 sps:$4 sm:$0xff]   ;;  %v34_v24 = vld [vmem:[%s2166_s0 + $0x30] sm:$0x11] }
  0x31   :  { %202 = vmatmul.mubr.bf16.gmra.mxu0 %v1585_v18  ;;  %319 = vmatmul.mubr.bf16.gmra.mxu1 %v1588_v19  ;;  %v1594_v23 = vld [vmem:[%s2166_s0 + $0x58] ss:$8 sps:$4 sm:$0xff]   ;;  %v1394_v25 = vld [vmem:[%s2166_s0 + $0x68] sm:$0x11]  ;;  %v1373_v26 = vcombine.high %v34_v24, %v34_v24  ;;  %v1372_v28 = vcombine.low %v34_v24, %v34_v24  ;;  %v1601_v30 = vld [vmem:[%s2166_s0 + $0x74] ss:$8 sps:$4 sm:$0xff]  }
  0x32   :  { %407 = vmatpush1.bf16.msra.mxu0 %v1750_v3  ;;  %531 = vmatpush1.bf16.msra.mxu1 %v1750_v3  ;;  %v1402_v27 = vcombine.high %v1394_v25, %v1394_v25  ;;  %v1401_v29 = vcombine.low %v1394_v25, %v1394_v25  ;;  %v1604_v31 = vld [vmem:[%s2166_s0 + $0xac] ss:$8 sps:$4 sm:$0xff]   ;;  %v1599_v32 = vld [vmem:[%s2166_s0 + $0x70] ss:$8 sps:$4 sm:$0xff]   ;;  %v1608_v35 = vld [vmem:[%s2166_s0 + $0xbc] ss:$8 sps:$4 sm:$0xff]  }
  0x33   :  { %408 = vmatprep.subr.bf16.mxu0 %v1677_v1  ;;  %532 = vmatprep.subr.bf16.mxu1 %v1677_v1  ;;  %v1602_v33 = vld [vmem:[%s2166_s0 + $0xa8] ss:$8 sps:$4 sm:$0xff]   ;;  %v1605_v34 = vld [vmem:[%s2166_s0 + $0x84] ss:$8 sps:$4 sm:$0xff]   ;;  %v1610_v37 = vld [vmem:[%s2166_s0 + $0xb8] ss:$8 sps:$4 sm:$0xff]  }
  0x34   :  { %1386 = vmatprep.mubr.msk.bf16.mxu0 %vm144_vm0, %v1589_v20  ;;  %1405 = vmatprep.mubr.msk.bf16.mxu1 %vm144_vm0, %v1592_v21  ;;  %v1607_v36 = vld [vmem:[%s2166_s0 + $0x80] ss:$8 sps:$4 sm:$0xff]   ;;  %v1611_v38 = vld [vmem:[%s2166_s0 + $0x94] ss:$8 sps:$4 sm:$0xff]   ;;  %v1613_v42 = vld [vmem:[%s2166_s0 + $0x90] ss:$8 sps:$4 sm:$0xff]  }
  0x35   :  { %v1614_v39 = vld [vmem:[%s2166_s0 + $0xcc] ss:$8 sps:$4 sm:$0xff]   ;;  %v1413_v40 = vld [vmem:[%s2166_s0 + $0xa0] sm:$0x11]  ;;  %v1432_v41 = vld [vmem:[%s2166_s0 + $0xd8] sm:$0x11] }
  0x36   :  { %409 = vmatpush1.bf16.msra.mxu0 %v1759_v4  ;;  %533 = vmatpush1.bf16.msra.mxu1 %v1759_v4  ;;  %v1616_v43 = vld [vmem:[%s2166_s0 + $0xc8] ss:$8 sps:$4 sm:$0xff]   ;;  %v1421_v44 = vcombine.high %v1413_v40, %v1413_v40  ;;  %v1440_v45 = vcombine.high %v1432_v41, %v1432_v41  ;;  %v1420_v46 = vcombine.low %v1413_v40, %v1413_v40  ;;  %v1973_v21 = vld [vmem:[%s2168_s2] ss:$0 sm:$0xff]  ;;  %vm618_vm2 = vcmask 130048   ;;  %s1678_s2 = smov 32  }
  0x37   :  { %410 = vmatprep.subr.bf16.mxu0 %v1677_v1  ;;  %534 = vmatprep.subr.bf16.mxu1 %v1677_v1  ;;  %v1439_v47 = vcombine.low %v1432_v41, %v1432_v41  ;;  %vm625_vm3 = vcmask 123904   ;;  %s1679_s29 = smov 16   ;;  %s1680_s30 = smov 64   ;;  %vm641_vm4 = vcmask 255104   ;;  %vm655_vm5 = vcmask 386304  }
  0x38   :  { %s1681_s8 = smov 48   ;;  %s1682_s9 = smov 96   ;;  %vm669_vm6 = vcmask 517504   ;;  %vm683_vm7 = vcmask 648704   ;;  %vm697_vm8 = vcmask 779904   ;;  %vm711_vm9 = vcmask 911104  }
  0x39   :  { %210 = vmatmul.mubr.bf16.gmra.mxu0 %v1591_v22  ;;  %327 = vmatmul.mubr.bf16.gmra.mxu1 %v1594_v23  ;;  %s1683_s10 = smov 80   ;;  %s1684_s17 = smov 112   ;;  %vm725_vm10 = vcmask 1042304   ;;  %vm1305_vm11 = vcmask 1043456   ;;  %vm1687_vm12 = vmmov 0   ;;  %vm1301_vm13 = vcmask 982016  }
  0x3a   :  { %411 = vmatpush1.bf16.msra.mxu0 %v1775_v7  ;;  %535 = vmatpush1.bf16.msra.mxu1 %v1775_v7  ;;  %s1688_s12 = smov [#allocation4]   ;;  %vm1350_vm14 = vcmask 680960  }
  0x3b   :  { %412 = vmatprep.subr.bf16.mxu0 %v1677_v1  ;;  %536 = vmatprep.subr.bf16.mxu1 %v1677_v1 }
  0x3c   :  { %1387 = vmatprep.mubr.msk.bf16.mxu0 %vm144_vm0, %v1373_v26  ;;  %1406 = vmatprep.mubr.msk.bf16.mxu1 %vm144_vm0, %v1402_v27 }
  0x3e   :  { %413 = vmatpush1.bf16.msra.mxu0 %v1785_v8  ;;  %537 = vmatpush1.bf16.msra.mxu1 %v1785_v8 }
  0x3f   :  { %414 = vmatprep.subr.bf16.mxu0 %v1677_v1  ;;  %538 = vmatprep.subr.bf16.mxu1 %v1677_v1 }
  0x41   :  { %218 = vmatmul.mubr.bf16.gmra.mxu0 %v1372_v28  ;;  %335 = vmatmul.mubr.bf16.gmra.mxu1 %v1401_v29 }
  0x42   :  { %415 = vmatpush1.bf16.msra.mxu0 %v1792_v9  ;;  %539 = vmatpush1.bf16.msra.mxu1 %v1792_v9 }
  0x43   :  { %416 = vmatprep.subr.bf16.mxu0 %v1677_v1  ;;  %540 = vmatprep.subr.bf16.mxu1 %v1677_v1 }
  0x44   :  { %1422 = vmatprep.mubr.msk.bf16.mxu0 %vm144_vm0, %v1601_v30  ;;  %1441 = vmatprep.mubr.msk.bf16.mxu1 %vm144_vm0, %v1604_v31 }
  0x46   :  { %417 = vmatpush1.bf16.msra.mxu0 %v1806_v11  ;;  %541 = vmatpush1.bf16.msra.mxu1 %v1806_v11 }
  0x47   :  { %430 = vmatprep.subr.bf16.mxu0 %v1677_v1  ;;  %554 = vmatprep.subr.bf16.mxu1 %v1677_v1 }
  0x4a   :  { %431 = vmatpush2.bf16.msra.mxu0 %v1808_v12  ;;  %555 = vmatpush2.bf16.msra.mxu1 %v1808_v12 }
  0x4b   :  { %432 = vmatprep.subr.bf16.mxu0 %v1677_v1  ;;  %556 = vmatprep.subr.bf16.mxu1 %v1677_v1 }
  0x4e   :  { %433 = vmatpush2.bf16.msra.mxu0 %v1819_v13  ;;  %557 = vmatpush2.bf16.msra.mxu1 %v1819_v13 }
  0x4f   :  { %1192 = vmatprep.subr.bf16.mxu1 %v1677_v1 }
  0x51   :  { %435 = vmatmul.mubr.bf16.vlgmr.msra.gmra.mxu0 %v1599_v32  ;;  %559 = vmatmul.mubr.bf16.vlgmr.msra.gmra.mxu1 %v1602_v33 }
  0x52   :  { %1423 = vmatprep.mubr.msk.bf16.mxu0 %vm144_vm0, %v1605_v34  ;;  %1442 = vmatprep.mubr.msk.bf16.mxu1 %vm144_vm0, %v1608_v35 }
  0x59   :  { %443 = vmatmul.mubr.bf16.gmra.mxu0 %v1607_v36  ;;  %567 = vmatmul.mubr.bf16.gmra.mxu1 %v1610_v37 }
  0x5a   :  { %1424 = vmatprep.mubr.msk.bf16.mxu0 %vm144_vm0, %v1611_v38  ;;  %1443 = vmatprep.mubr.msk.bf16.mxu1 %vm144_vm0, %v1614_v39 }
  0x61   :  { %451 = vmatmul.mubr.bf16.gmra.mxu0 %v1613_v42  ;;  %575 = vmatmul.mubr.bf16.gmra.mxu1 %v1616_v43 }
  0x62   :  { %1425 = vmatprep.mubr.msk.bf16.mxu0 %vm144_vm0, %v1421_v44  ;;  %1444 = vmatprep.mubr.msk.bf16.mxu1 %vm144_vm0, %v1440_v45 }
  0x69   :  { %459 = vmatmul.mubr.bf16.gmra.mxu0 %v1420_v46  ;;  %583 = vmatmul.mubr.bf16.gmra.mxu1 %v1439_v47 }
  0xe9   :  { %v195_v48 = vpop.f32.mrf.mxu0  ;;  %v312_v49 = vpop.f32.mrf.mxu1 }
  0xea   :  { %v342_v17 = vmax.f32 %v195_v48, %v312_v49 }
  0xeb   :  { %v197_v50 = vpop.f32.mrf.mxu0  ;;  %v314_v51 = vpop.f32.mrf.mxu1 }
  0xed   :  { %v198_v52 = vpop.f32.mrf.mxu0  ;;  %v315_v53 = vpop.f32.mrf.mxu1 }
  0xee   :  { %v343_v24 = vmax.f32 %v198_v52, %v315_v53 }
  0xef   :  { %v200_v54 = vpop.f32.mrf.mxu0  ;;  %v317_v55 = vpop.f32.mrf.mxu1 }
  0xf1   :  { %v203_v56 = vpop.f32.mrf.mxu0  ;;  %v320_v57 = vpop.f32.mrf.mxu1 }
  0xf2   :  { %v344_v32 = vmax.f32 %v203_v56, %v320_v57 }
  0xf3   :  { %v205_v58 = vpop.f32.mrf.mxu0  ;;  %v322_v59 = vpop.f32.mrf.mxu1 }
  0xf5   :  { %v206_v60 = vpop.f32.mrf.mxu0  ;;  %v323_v61 = vpop.f32.mrf.mxu1 }
  0xf6   :  { %v345_v41 = vmax.f32 %v206_v60, %v323_v61 }
  0xf7   :  { %v208_v62 = vpop.f32.mrf.mxu0  ;;  %v325_v63 = vpop.f32.mrf.mxu1 }
  0xf9   :  { %v1960_v0 = vpop.f32.mrf.mxu0  ;;  %v328_v2 = vpop.f32.mrf.mxu1 }
  0xfa   :  { %v346_v50 = vmax.f32 %v1960_v0, %v328_v2 }
  0xfb   :  { %v213_v3 = vpop.f32.mrf.mxu0  ;;  %v330_v4 = vpop.f32.mrf.mxu1 }
  0xfd   :  { %v1962_v5 = vpop.f32.mrf.mxu0  ;;  %v1964_v6 = vpop.f32.mrf.mxu1 }
  0xfe   :  { %v347_v62 = vmax.f32 %v1962_v5, %v1964_v6 }
  0xff   :  { %v216_v7 = vpop.f32.mrf.mxu0  ;;  %v333_v8 = vpop.f32.mrf.mxu1 }
 0x101   :  { %v1966_v9 = vpop.f32.mrf.mxu0  ;;  %v1968_v10 = vpop.f32.mrf.mxu1 }
 0x102   :  { %v348_v5 = vmax.f32 %v1966_v9, %v1968_v10 }
 0x103   :  { %v221_v11 = vpop.f32.mrf.mxu0  ;;  %v338_v12 = vpop.f32.mrf.mxu1 }
 0x105   :  { %v222_v13 = vpop.f32.mrf.mxu0  ;;  %v339_v14 = vpop.f32.mrf.mxu1 }
 0x107   :  { %v223_v15 = vpop.f32.mrf.mxu0  ;;  %v340_v16 = vpop.f32.mrf.mxu1 }
 0x111   :  { %v436_v18 = vpop.f32.mrf.mxu0  ;;  %v560_v19 = vpop.f32.mrf.mxu1 }
 0x112   :  { %v466_v20 = vmax.f32 %v342_v17, %v436_v18 }
 0x113   :  { %v438_v22 = vpop.f32.mrf.mxu0  ;;  %v562_v23 = vpop.f32.mrf.mxu1 }
 0x114   :  { %v590_v25 = vmax.f32 %v466_v20, %v560_v19  ;;  %v1621_v23 = vld [vmem:[%s2169_s3 + $0x78] sm:$0xff]  }
 0x115   :  { %v439_v26 = vpop.f32.mrf.mxu0  ;;  %v563_v27 = vpop.f32.mrf.mxu1  ;;  %1504 = vmatprep.subr.bf16.mxu0 %v1621_v23 }
 0x116   :  { %v604_v28 = vadd.f32 %v1973_v21, %v590_v25  ;;  %v467_v29 = vmax.f32 %v343_v24, %v439_v26  ;;  %v1622_v24 = vld [vmem:[%s2169_s3 + $0xb8] sm:$0xff]  }
 0x117   :  { %v441_v30 = vpop.f32.mrf.mxu0  ;;  %v565_v31 = vpop.f32.mrf.mxu1  ;;  %1193 = vmatpush1.bf16.msra.mxu1 %v1622_v24 }
 0x118   :  { %v611_v33 = vmax.f32 %v604_v28, 0.0  ;;  %v591_v34 = vmax.f32 %v467_v29, %v563_v27  ;;  %v1623_v27 = vld [vmem:[%s2169_s3 + $0x38] sm:$0xff]   ;;  %1194 = vmatprep.subr.bf16.mxu1 %v1677_v1 }
 0x119   :  { %v444_v35 = vpop.f32.mrf.mxu0  ;;  %v568_v36 = vpop.f32.mrf.mxu1  ;;  %1505 = vmatpush3.bf16.msra.mxu0 %v1623_v27 }
 0x11a   :  { %619 = vst.msk [vmem:[#allocation2] sm:$0xff] %vm618_vm2, %v611_v33  ;;  %v605_v37 = vadd.f32 %v1973_v21, %v591_v34  ;;  %v468_v38 = vmax.f32 %v344_v32, %v444_v35  ;;  %v1624_v35 = vld [vmem:[%s2169_s3 + $0x70] sm:$0xff]  }
 0x11b   :  { %v446_v39 = vpop.f32.mrf.mxu0  ;;  %v570_v40 = vpop.f32.mrf.mxu1  ;;  %1506 = vmatprep.subr.bf16.mxu0 %v1624_v35 }
 0x11c   :  { %v612_v42 = vmax.f32 %v605_v37, 0.0  ;;  %v592_v43 = vmax.f32 %v468_v38, %v568_v36  ;;  %v1625_v36 = vld [vmem:[%s2169_s3 + $0xb0] sm:$0xff]  }
 0x11d   :  { %v447_v44 = vpop.f32.mrf.mxu0  ;;  %v571_v45 = vpop.f32.mrf.mxu1  ;;  %v1626_v37 = vld [vmem:[%s2169_s3 + $0x30] sm:$0xff]   ;;  %1195 = vmatpush1.bf16.msra.mxu1 %v1625_v36 }
 0x11e   :  { %620 = vst.msk [vmem:[#allocation2 + $0x8] sm:$0xff] %vm618_vm2, %v612_v42  ;;  %v606_v46 = vadd.f32 %v1973_v21, %v592_v43  ;;  %v469_v47 = vmax.f32 %v345_v41, %v447_v44  ;;  %1507 = vmatpush3.bf16.msra.mxu0 %v1626_v37  ;;  %v1627_v41 = vld [vmem:[%s2169_s3 + $0x68] sm:$0xff]   ;;  %1196 = vmatprep.subr.bf16.mxu1 %v1677_v1 }
 0x11f   :  { %v449_v48 = vpop.f32.mrf.mxu0  ;;  %v573_v49 = vpop.f32.mrf.mxu1  ;;  %v1628_v42 = vld [vmem:[%s2169_s3 + $0xa8] sm:$0xff]   ;;  %1508 = vmatprep.subr.bf16.mxu0 %v1627_v41 }
 0x120   :  { %v613_v51 = vmax.f32 %v606_v46, 0.0  ;;  %v593_v52 = vmax.f32 %v469_v47, %v571_v45  ;;  %v1629_v43 = vld [vmem:[%s2169_s3 + $0x28] sm:$0xff]   ;;  %v1630_v46 = vld [vmem:[%s2169_s3 + $0x60] sm:$0xff]  }
 0x121   :  { %v452_v53 = vpop.f32.mrf.mxu0  ;;  %v1447_v54 = vld.sshfl [vmem:[#allocation2 + $0x4] sm:$0x3 pattern:$0x76325410]  ;;  %v576_v55 = vpop.f32.mrf.mxu1  ;;  %v627_v56 = vld [vmem:[#allocation2] sm:$0x3]  ;;  %1197 = vmatpush1.bf16.msra.mxu1 %v1628_v42 }
 0x122   :  { %621 = vst.msk [vmem:[#allocation2 + $0x10] sm:$0xff] %vm618_vm2, %v613_v51  ;;  %v607_v57 = vadd.f32 %v1973_v21, %v593_v52  ;;  %v470_v58 = vmax.f32 %v346_v50, %v452_v53  ;;  %652 = vrot.lane.b32.xlu1 %v1447_v54, %s1678_s2  ;;  %v1446_v59 = vld.sshfl [vmem:[#allocation2 + $0x2] sm:$0x3 pattern:$0x76325410]  ;;  %1509 = vmatpush3.bf16.msra.mxu0 %v1629_v43  ;;  %v1633_v52 = vld [vmem:[%s2169_s3 + $0x58] sm:$0xff]  }
 0x123   :  { %628 = vst.msk [vmem:[#allocation3] sm:$0x3] %vm625_vm3, %v627_v56  ;;  %638 = vrot.lane.b32.xlu0 %v1446_v59, %s1679_s29  ;;  %v454_v60 = vpop.f32.mrf.mxu0  ;;  %v578_v61 = vpop.f32.mrf.mxu1  ;;  %v1448_v11 = vld.sshfl [vmem:[#allocation2 + $0x6] sm:$0x3 pattern:$0x76325410]  ;;  %1198 = vmatprep.subr.bf16.mxu1 %v1677_v1 }
 0x124   :  { %v614_v63 = vmax.f32 %v607_v57, 0.0  ;;  %v594_v0 = vmax.f32 %v470_v58, %v576_v55  ;;  %v1631_v47 = vld [vmem:[%s2169_s3 + $0xa0] sm:$0xff]   ;;  %1510 = vmatprep.subr.bf16.mxu0 %v1630_v46  ;;  %v1634_v53 = vld [vmem:[%s2169_s3 + $0x98] sm:$0xff]   ;;  %v1636_v57 = vld [vmem:[%s2169_s3 + $0x50] sm:$0xff]  }
 0x125   :  { %v455_v2 = vpop.f32.mrf.mxu0  ;;  %v1449_v3 = vld.sshfl [vmem:[#allocation2 + $0x8] sm:$0x3 pattern:$0x76325410]  ;;  %v579_v4 = vpop.f32.mrf.mxu1  ;;  %v1632_v48 = vld [vmem:[%s2169_s3 + $0x20] sm:$0xff]   ;;  %1199 = vmatpush1.bf16.msra.mxu1 %v1631_v47  ;;  %v1635_v54 = vld [vmem:[%s2169_s3 + $0x18] sm:$0xff]  }
 0x126   :  { %622 = vst.msk [vmem:[#allocation2 + $0x18] sm:$0xff] %vm618_vm2, %v614_v63  ;;  %v608_v7 = vadd.f32 %v1973_v21, %v594_v0  ;;  %v471_v8 = vmax.f32 %v347_v62, %v455_v2  ;;  %680 = vrot.lane.b32.xlu1 %v1449_v3, %s1680_s30  ;;  %v1451_v16 = vld.sshfl [vmem:[#allocation2 + $0xc] sm:$0x3 pattern:$0x76325410]  ;;  %1511 = vmatpush3.bf16.msra.mxu0 %v1632_v48  ;;  %v1637_v58 = vld [vmem:[%s2169_s3 + $0x90] sm:$0xff]  }
 0x127   :  { %666 = vrot.lane.b32.xlu0 %v1448_v11, %s1681_s8  ;;  %v457_v12 = vpop.f32.mrf.mxu0  ;;  %v581_v13 = vpop.f32.mrf.mxu1  ;;  %v1450_v22 = vld.sshfl [vmem:[#allocation2 + $0xa] sm:$0x3 pattern:$0x76325410]  ;;  %1200 = vmatprep.subr.bf16.mxu1 %v1677_v1  ;;  %v1638_v59 = vld [vmem:[%s2169_s3 + $0x10] sm:$0xff]   ;;  %v1642_v2 = vld [vmem:[%s2169_s3 + $0x40] sm:$0xff]  }
 0x128   :  { %v615_v6 = vmax.f32 %v608_v7, 0.0  ;;  %v595_v14 = vmax.f32 %v471_v8, %v579_v4  ;;  %v1452_v32 = vld.sshfl [vmem:[#allocation2 + $0xe] sm:$0x3 pattern:$0x76325410]  ;;  %1512 = vmatprep.subr.bf16.mxu0 %v1633_v52  ;;  %v1643_v4 = vld [vmem:[%s2169_s3 + $0x80] sm:$0xff]  }
 0x129   :  { %v460_v15 = vpop.f32.mrf.mxu0  ;;  %v584_v17 = vpop.f32.mrf.mxu1  ;;  %v727_v18 = vld [vmem:[#allocation2 + $0x10] sm:$0x3]  ;;  %v1455_v28 = vld.sshfl [vmem:[#allocation2 + $0x16] sm:$0x3 pattern:$0x76325410]  ;;  %1201 = vmatpush1.bf16.msra.mxu1 %v1634_v53 }
 0x12a   :  { %623 = vst.msk [vmem:[#allocation2 + $0x20] sm:$0xff] %vm618_vm2, %v615_v6  ;;  %v609_v19 = vadd.f32 %v1973_v21, %v595_v14  ;;  %v472_v20 = vmax.f32 %v348_v5, %v460_v15  ;;  %708 = vrot.lane.b32.xlu1 %v1451_v16, %s1682_s9  ;;  %v1453_v40 = vld.sshfl [vmem:[#allocation2 + $0x12] sm:$0x3 pattern:$0x76325410]  ;;  %1513 = vmatpush3.bf16.msra.mxu0 %v1635_v54  ;;  %v1639_v60 = vld [vmem:[%s2169_s3 + $0x48] sm:$0xff]  }
 0x12b   :  { %728 = vst.msk [vmem:[#allocation3 + $0x2] sm:$0x3] %vm625_vm3, %v727_v18  ;;  %694 = vrot.lane.b32.xlu0 %v1450_v22, %s1683_s10  ;;  %v462_v9 = vpop.f32.mrf.mxu0  ;;  %v586_v10 = vpop.f32.mrf.mxu1  ;;  %v1454_v45 = vld.sshfl [vmem:[#allocation2 + $0x14] sm:$0x3 pattern:$0x76325410]  ;;  %1202 = vmatprep.subr.bf16.mxu1 %v1677_v1 }
 0x12c   :  { %v616_v25 = vmax.f32 %v609_v19, 0.0  ;;  %v596_v26 = vmax.f32 %v472_v20, %v584_v17  ;;  %1514 = vmatprep.subr.bf16.mxu0 %v1636_v57  ;;  %v1640_v62 = vld [vmem:[%s2169_s3 + $0x88] sm:$0xff]   ;;  %v1644_v8 = vld [vmem:[%s2169_s3] sm:$0xff]   ;;  %v1685_v13 = vmov 0.0   ;;  %v1648_v48 = vld [vmem:[%s2171_s5 + $0x30] sm:$0xff]  }
 0x12d   :  { %v463_v29 = vpop.f32.mrf.mxu0  ;;  %v587_v30 = vpop.f32.mrf.mxu1  ;;  %v1457_v38 = vld.sshfl [vmem:[#allocation2 + $0x1a] sm:$0x3 pattern:$0x76325410]  ;;  %1203 = vmatpush1.bf16.msra.mxu1 %v1637_v58  ;;  %v1641_v0 = vld [vmem:[%s2169_s3 + $0x8] sm:$0xff]   ;;  %v1646_v12 = vld [vmem:[%s2169_s3 + $0xc0] sm:$0xff]  }
 0x12e   :  { %624 = vst.msk [vmem:[#allocation2 + $0x28] sm:$0xff] %vm618_vm2, %v616_v25  ;;  %v610_v31 = vadd.f32 %v1973_v21, %v596_v26  ;;  %764 = vrot.lane.b32.xlu1 %v1455_v28, %s1681_s8  ;;  %v1456_v51 = vld.sshfl [vmem:[#allocation2 + $0x18] sm:$0x3 pattern:$0x76325410]  ;;  %1515 = vmatpush3.bf16.msra.mxu0 %v1638_v59  ;;  %v1652_v52 = vld [vmem:[%s2171_s5 + $0x10] sm:$0xff]  }
 0x12f   :  { %722 = vrot.lane.b32.xlu0 %v1452_v32, %s1684_s17  ;;  %v464_v33 = vpop.f32.mrf.mxu0  ;;  %v588_v34 = vpop.f32.mrf.mxu1  ;;  %v1458_v55 = vld.sshfl [vmem:[#allocation2 + $0x1c] sm:$0x3 pattern:$0x76325410]  ;;  %1204 = vmatprep.subr.bf16.mxu1 %v1677_v1  ;;  %v1686_v30 = vmov 1983009808   ;;  %v921_v32 = vlaneseq }
 0x130   :  { %v617_v21 = vmax.f32 %v610_v31, 0.0  ;;  %1516 = vmatprep.subr.bf16.mxu0 %v1639_v60  ;;  %v1459_v3 = vld.sshfl [vmem:[#allocation2 + $0x1e] sm:$0x3 pattern:$0x76325410]  ;;  %v919_v31 = vunpack.c.l.s4 %v1686_v30  ;;  %v1653_v53 = vld [vmem:[%s2171_s5 + $0x8] sm:$0xff]  }
 0x131   :  { %v820_v39 = vld [vmem:[#allocation2 + $0x20] sm:$0x3]  ;;  %v1460_v44 = vld.sshfl [vmem:[#allocation2 + $0x22] sm:$0x3 pattern:$0x76325410]  ;;  %1205 = vmatpush1.bf16.msra.mxu1 %v1640_v62 }
 0x132   :  { %626 = vst.msk [vmem:[#allocation2 + $0x30] sm:$0x3] %vm625_vm3, %v617_v21  ;;  %790 = vrot.lane.b32.xlu1 %v1457_v38, %s1683_s10  ;;  %821 = vst.msk [vmem:[#allocation3 + $0x4] sm:$0x3] %vm625_vm3, %v820_v39  ;;  %1517 = vmatpush3.bf16.msra.mxu0 %v1641_v0  ;;  %v920_v34 = vunpack.c.0.s8 %v919_v31  ;;  %v922_v35 = vshrl.u32 %v921_v32, 7  ;;  %v1654_v54 = vld [vmem:[%s2171_s5] sm:$0xff]  }
 0x133   :  { %738 = vrot.lane.b32.xlu0 %v1453_v40, %s1679_s29  ;;  %v1461_v50 = vld.sshfl [vmem:[#allocation2 + $0x24] sm:$0x3 pattern:$0x76325410]  ;;  %1206 = vmatprep.subr.bf16.mxu1 %v1677_v1  ;;  %v1647_v39 = vld [vmem:[%s2171_s5 + $0x38] ss:$0 sps:$4 sm:$0xff]  }
 0x134   :  { %v1462_v63 = vld.sshfl [vmem:[#allocation2 + $0x26] sm:$0x3 pattern:$0x76325410]  ;;  %1518 = vmatprep.subr.bf16.mxu0 %v1642_v2  ;;  %v923_v36 = vsub.s32 %v920_v34, %v922_v35  ;;  %v1467_v57 = vld [vmem:[%s2170_s4] ss:$0 sm:$0xff] }
 0x135   :  { %v1463_v56 = vld.sshfl [vmem:[#allocation2 + $0x28] sm:$0x3 pattern:$0x76325410]  ;;  %1207 = vmatpush1.bf16.msra.mxu1 %v1643_v4  ;;  %s1358_s4 = sshll.u32 %s1688_s12, 4  ;;  %s1359_s4 = int_to_ptr.vmem [resolvable:$true] %s1358_s4 }
 0x136   :  { %831 = vrot.lane.b32.xlu1 %v1460_v44, %s1679_s29  ;;  %v1465_v61 = vld.sshfl [vmem:[#allocation2 + $0x2c] sm:$0x3 pattern:$0x76325410]  ;;  %1519 = vmatpush3.bf16.msra.mxu0 %v1644_v8  ;;  %v1494_v8 = vld [vmem:[%s2172_s6] ss:$0 sm:$0xff]  ;;  %p1660_p1 = scmp.lt.s32.totalorder %s1359_s4, %s1359_s4 }
 0x137   :  { %751 = vrot.lane.b32.xlu0 %v1454_v45, %s1678_s2  ;;  %v1464_v7 = vld.sshfl [vmem:[#allocation2 + $0x2a] sm:$0x3 pattern:$0x76325410]  ;;  %1222 = vmatprep.subr.bf16.mxu1 %v1677_v1  ;;  %v1307_v45 = vsel %vm1305_vm11, %v1647_v39, 0  ;;  %s1655_s13 = scalar_lea.vmem %s1359_s4, 32 }
 0x138   :  { %v1466_v11 = vld.sshfl [vmem:[#allocation2 + $0x2e] sm:$0x3 pattern:$0x76325410]  ;;  %1535 = vmatprep.subr.bf16.mxu0 %v1685_v13  ;;  %p1656_p0 = scmp.ne.s32.totalorder %s1359_s4, %s1655_s13  ;;  %p1661_p2 = scmp.lt.s32.totalorder %s1655_s13, %s1655_s13 }
 0x139   :  { %v913_v49 = vld [vmem:[#allocation2 + $0x30] sm:$0x3]  ;;  %1223 = vmatpush2.bf16.msra.mxu1 %v1646_v12 }
 0x13a   :  { %914 = vst.msk [vmem:[#allocation3 + $0x6] sm:$0x3] %vm625_vm3, %v913_v49  ;;  %844 = vrot.lane.b32.xlu1 %v1461_v50, %s1678_s2  ;;  %v1649_v49 = vld [vmem:[%s2171_s5 + $0x28] sm:$0xff]   ;;  %v1650_v50 = vld [vmem:[%s2171_s5 + $0x20] sm:$0xff]   ;;  %p1662_p3 = por %p1661_p2, %p1660_p1 }
 0x13b   :  { %777 = vrot.lane.b32.xlu0 %v1456_v51, %s1680_s30  ;;  %v1651_v51 = vld [vmem:[%s2171_s5 + $0x18] sm:$0xff]  }
 0x13c   :  { %p1663_p4 = pnand %p1662_p3, %p1656_p0 }
 0x13e   :  { %870 = vrot.lane.b32.xlu1 %v1463_v56, %s1680_s30 }
 0x13f   :  { %803 = vrot.lane.b32.xlu0 %v1458_v55, %s1682_s9 }
 0x142   :  { %896 = vrot.lane.b32.xlu1 %v1465_v61, %s1682_s9 }
 0x143   :  { %857 = vrot.lane.b32.xlu0 %v1462_v63, %s1681_s8 }
 0x146   :  { %816 = vrot.lane.b32.xlu1 %v1459_v3, %s1684_s17 }
 0x147   :  { %883 = vrot.lane.b32.xlu0 %v1464_v7, %s1683_s10 }
 0x14b   :  { %909 = vrot.lane.b32.xlu0 %v1466_v11, %s1684_s17 }
 0x194   :  { %v653_v5 = vpop.permute.xlu1 %652 }
 0x195   :  { %v639_v6 = vpop.permute.xlu0 %638 }
 0x196   :  { %642 = vst.msk [vmem:[#allocation3] sm:$0x3] %vm641_vm4, %v639_v6 }
 0x197   :  { %656 = vst.msk [vmem:[#allocation3] sm:$0x3] %vm655_vm5, %v653_v5 }
 0x198   :  { %v681_v1 = vpop.permute.xlu1 %680 }
 0x199   :  { %v667_v14 = vpop.permute.xlu0 %666 }
 0x19a   :  { %670 = vst.msk [vmem:[#allocation3] sm:$0x3] %vm669_vm6, %v667_v14 }
 0x19b   :  { %684 = vst.msk [vmem:[#allocation3] sm:$0x3] %vm683_vm7, %v681_v1 }
 0x19c   :  { %v709_v15 = vpop.permute.xlu1 %708 }
 0x19d   :  { %v695_v16 = vpop.permute.xlu0 %694 }
 0x19e   :  { %698 = vst.msk [vmem:[#allocation3] sm:$0x3] %vm697_vm8, %v695_v16 }
 0x19f   :  { %712 = vst.msk [vmem:[#allocation3] sm:$0x3] %vm711_vm9, %v709_v15 }
 0x1a0   :  { %v765_v17 = vpop.permute.xlu1 %764 }
 0x1a1   :  { %v723_v18 = vpop.permute.xlu0 %722 }
 0x1a2   :  { %726 = vst.msk [vmem:[#allocation3] sm:$0x3] %vm725_vm10, %v723_v18 }
 0x1a4   :  { %v791_v19 = vpop.permute.xlu1 %790 }
 0x1a5   :  { %v739_v20 = vpop.permute.xlu0 %738 }
 0x1a6   :  { %741 = vst.msk [vmem:[#allocation3 + $0x2] sm:$0x3] %vm641_vm4, %v739_v20 }
 0x1a8   :  { %v832_v22 = vpop.permute.xlu1 %831 }
 0x1a9   :  { %v752_v9 = vpop.permute.xlu0 %751  ;;  %834 = vst.msk [vmem:[#allocation3 + $0x4] sm:$0x3] %vm641_vm4, %v832_v22 }
 0x1aa   :  { %754 = vst.msk [vmem:[#allocation3 + $0x2] sm:$0x3] %vm655_vm5, %v752_v9 }
 0x1ab   :  { %767 = vst.msk [vmem:[#allocation3 + $0x2] sm:$0x3] %vm669_vm6, %v765_v17 }
 0x1ac   :  { %v845_v10 = vpop.permute.xlu1 %844 }
 0x1ad   :  { %v778_v23 = vpop.permute.xlu0 %777  ;;  %847 = vst.msk [vmem:[#allocation3 + $0x4] sm:$0x3] %vm655_vm5, %v845_v10 }
 0x1ae   :  { %780 = vst.msk [vmem:[#allocation3 + $0x2] sm:$0x3] %vm683_vm7, %v778_v23 }
 0x1af   :  { %793 = vst.msk [vmem:[#allocation3 + $0x2] sm:$0x3] %vm697_vm8, %v791_v19 }
 0x1b0   :  { %v871_v24 = vpop.permute.xlu1 %870 }
 0x1b1   :  { %v804_v25 = vpop.permute.xlu0 %803 }
 0x1b2   :  { %806 = vst.msk [vmem:[#allocation3 + $0x2] sm:$0x3] %vm711_vm9, %v804_v25 }
 0x1b4   :  { %v897_v26 = vpop.permute.xlu1 %896 }
 0x1b5   :  { %v858_v27 = vpop.permute.xlu0 %857 }
 0x1b6   :  { %860 = vst.msk [vmem:[#allocation3 + $0x4] sm:$0x3] %vm669_vm6, %v858_v27 }
 0x1b7   :  { %873 = vst.msk [vmem:[#allocation3 + $0x4] sm:$0x3] %vm683_vm7, %v871_v24 }
 0x1b8   :  { %v817_v28 = vpop.permute.xlu1 %816 }
 0x1b9   :  { %v884_v29 = vpop.permute.xlu0 %883  ;;  %819 = vst.msk [vmem:[#allocation3 + $0x2] sm:$0x3] %vm725_vm10, %v817_v28 }
 0x1ba   :  { %886 = vst.msk [vmem:[#allocation3 + $0x4] sm:$0x3] %vm697_vm8, %v884_v29 }
 0x1bb   :  { %899 = vst.msk [vmem:[#allocation3 + $0x4] sm:$0x3] %vm711_vm9, %v897_v26 }
 0x1bd   :  { %v910_v33 = vpop.permute.xlu0 %909 }
 0x1be   :  { %912 = vst.msk [vmem:[#allocation3 + $0x4] sm:$0x3] %vm725_vm10, %v910_v33 }
 0x1c5   :  { %v915_v21 = vld [vmem:[#allocation3] sm:$0xff] }
 0x1c6   :  { %v917_v37 = vcombine.high %v915_v21, %v915_v21  ;;  %v924_v38 = vrot.slane %v915_v21, %v923_v36 }
 0x1c8   :  { %v932_v40 = vcombine.high %v924_v38, %v924_v38  ;;  %v931_v41 = vrot.slane %v917_v37, %v923_v36  ;;  %v938_v44 = vpack.c.bf16 %v924_v38, %v924_v38 }
 0x1ca   :  { %v939_v42 = vpack.c.bf16 %v932_v40, %v932_v40  ;;  %v933_v43 = vcombine.high %v931_v41, %v931_v41  ;;  %v940_v47 = vpack.c.bf16 %v931_v41, %v931_v41 }
 0x1cc   :  { %1184 = vmatprep.mubr.bf16.mxu0 %v939_v42  ;;  %v941_v46 = vpack.c.bf16 %v933_v43, %v933_v43 }
 0x1cd   :  { %1185 = vmatmul.mubr.bf16.vlgmr.msra.gmra.mxu0 %v938_v44 }
 0x1ce   :  { %1493 = vmatprep.mubr.msk.bf16.mxu1 %vm618_vm2, %v941_v46  ;;  %1536 = vmatpush3.bf16.msra.mxu0 %v1307_v45 }
 0x1cf   :  { %1225 = vmatmul.mubr.bf16.vlgmr.msra.gmra.mxu1 %v940_v47  ;;  %1537 = vmatprep.subr.bf16.mxu0 %v1685_v13 }
 0x1d0   :  { %1551 = vmatprep.mubr.msk.bf16.mxu0 %vm1687_vm12, %v1685_v13 }
 0x1d2   :  { %1538 = vmatpush3.bf16.msra.mxu0 %v1648_v48 }
 0x1d3   :  { %1539 = vmatprep.subr.bf16.mxu0 %v1685_v13 }
 0x1d6   :  { %1540 = vmatpush3.bf16.msra.mxu0 %v1649_v49 }
 0x1d7   :  { %1541 = vmatprep.subr.bf16.mxu0 %v1685_v13 }
 0x1da   :  { %1542 = vmatpush3.bf16.msra.mxu0 %v1650_v50 }
 0x1db   :  { %1543 = vmatprep.subr.bf16.mxu0 %v1685_v13 }
 0x1de   :  { %1544 = vmatpush3.bf16.msra.mxu0 %v1651_v51 }
 0x1df   :  { %1545 = vmatprep.subr.bf16.mxu0 %v1685_v13 }
 0x1e2   :  { %1546 = vmatpush3.bf16.msra.mxu0 %v1652_v52 }
 0x1e3   :  { %1547 = vmatprep.subr.bf16.mxu0 %v1685_v13 }
 0x1e6   :  { %1548 = vmatpush3.bf16.msra.mxu0 %v1653_v53 }
 0x1e7   :  { %1549 = vmatprep.subr.bf16.mxu0 %v1685_v13 }
 0x1ea   :  { %1550 = vmatpush3.bf16.msra.mxu0 %v1654_v54 }
 0x28d   :  { %v1520_v55 = vpop.f32.mrf.mxu0 }
 0x28f   :  { %v1521_v56 = vpop.f32.mrf.mxu0  ;;  %v1226_v58 = vpop.f32.mrf.mxu1 }
 0x290   :  { %v1522_v59 = vadd.f32 %v1521_v56, %v1520_v55 }
 0x291   :  { %v1523_v60 = vpop.f32.mrf.mxu0  ;;  %v1228_v61 = vpop.f32.mrf.mxu1 }
 0x292   :  { %v1187_v62 = vadd.f32 %v1522_v59, %v1467_v57 }
 0x293   :  { %v1524_v63 = vpop.f32.mrf.mxu0  ;;  %v1229_v0 = vpop.f32.mrf.mxu1 }
 0x294   :  { %v1227_v2 = vadd.f32 %v1226_v58, %v1187_v62 }
 0x295   :  { %v1230_v3 = vpop.f32.mrf.mxu1 }
 0x296   :  { %v1232_v4 = vmax.f32 %v1227_v2, 0.0 }
 0x298   :  { %v1233_v7 = vpack.c.bf16 %v1232_v4, %v1232_v4 }
 0x29a   :  { %1552 = vmatmul.mubr.msk.bf16.vlgmr.msra.gmra.mxu0 %vm1301_vm13, %v1233_v7 }
 0x35a   :  { %v1343_v11 = vpop.f32.mrf.mxu0 }
 0x35b   :  { %v1344_v12 = vadd.f32 %v1494_v8, %v1343_v11 }
 0x35c   :  { %v1553_v13 = vpop.f32.mrf.mxu0 }
 0x35d   :  { %v1349_v5 = vmax.f32 %v1344_v12, 0.0 }
 0x35e   :  { %v1346_v6 = vpop.f32.mrf.mxu0 }
 0x35f   :  { %1351 = vst.msk [vmem:[#allocation4] sm:$0x3] %vm1350_vm14, %v1349_v5 }
 0x360   :  { %v1554_v1 = vpop.f32.mrf.mxu0 }
 0x361   :  { %1666 = shalt.err (!%p1663_p4)
}
 0x362   :  { %1361 = dma.vmem_to_hbm [thread:$0]  %s1359_s4, 32, %s2173_s7, [#allocation5]  }
 0x363   :  { %1675 = dma.done.wait [#allocation5], 32  }
 0x364   :  { %1676 = vsyncadd [#allocation5], 4294967264 }
 0x365   :  { %1365 = vsyncpa [#allocation5], 1 }

</bundles_post_ra>
